<compile_context>
chip_gen: v6e
topology: v6e:2x2x1
jax: 0.10.0
libtpu: 0.0.40
codegen_flags: <defaults>
</compile_context>

<pallas_src>
import functools

import jax
import jax.numpy as jnp
from jax.experimental import pallas as pl
from jax.experimental.pallas import tpu as pltpu

COLOR_DIM = 3
GAUSSIAN_DIM = COLOR_DIM + 3 + 3 + 4 + 1          # 14 = xyz+scale+rot+opacity+color
POSE_DIM = 75
LBS_DIM = 24
HIDDEN_DIM = 64
GL_DIM = GAUSSIAN_DIM + LBS_DIM                   # 38: per-point feature columns
IN_CHANNELS = GL_DIM + POSE_DIM                   # 113
OUT_DIM = GAUSSIAN_DIM + LBS_DIM                  # 38
LN_EPS = 1e-5                                     # torch.nn.LayerNorm default
LEAKY_SLOPE = 0.2                                 # nn.LeakyReLU(0.2) in the module


def _layernorm(x, gamma, beta):
    # Two-pass LN (mean, then centred variance): same VPU/XLU op count as the
    # single-pass form but no E[x^2]-E[x]^2 cancellation.
    mu = jnp.mean(x, axis=-1, keepdims=True)
    d = x - mu
    var = jnp.mean(d * d, axis=-1, keepdims=True)
    return d * jax.lax.rsqrt(var + LN_EPS) * gamma + beta


def _leaky_relu(x, slope=LEAKY_SLOPE):
    return jnp.where(x > 0, x, slope * x)


def deformer_kernel(gl_ref, pose_ref, wgl_ref, vec_ref, w2_ref, w3_ref, b3_ref,
                    xyz_ref, scale_ref, rot_ref, lbs_ref):
    b = pl.program_id(1)                                     # batch index (inner axis)
    gl = gl_ref[...]                                         # (tm, 38) bf16, resident over b

    # Fused first linear: per-point projection on the MXU + precomputed per-pose
    # row (pose @ W_pose + b_fused done once per batch element on the host).
    h = jnp.dot(gl, wgl_ref[...], preferred_element_type=jnp.float32)   # (tm, 64) f32
    h = h + pose_ref[pl.ds(b, 1), :]

    # LayerNorm + LeakyReLU(0.2)     vec rows: [g1, bt1, b2, g2, bt2]
    h = _leaky_relu(_layernorm(h, vec_ref[0:1, :], vec_ref[1:2, :]))

    # Linear(64->64) + LayerNorm + LeakyReLU(0.2); bf16 operands, f32 accumulate.
    h = jnp.dot(h.astype(jnp.bfloat16), w2_ref[...],
                preferred_element_type=jnp.float32) + vec_ref[2:3, :]
    h = _leaky_relu(_layernorm(h, vec_ref[3:4, :], vec_ref[4:5, :]))

    # Final Linear(64->38).
    pred = jnp.dot(h.astype(jnp.bfloat16), w3_ref[...],
                   preferred_element_type=jnp.float32) + b3_ref[...]    # (tm, 38) f32

    # Fused epilogue: apply the offsets to the base gaussian attributes (which
    # are the leading columns of the gl tile) and emit consumer-shaped outputs.
    base = gl.astype(jnp.float32)
    xyz_ref[...] = base[:, 0:3] + pred[:, 0:3] * (1.0 / 10.0)
    scale_ref[...] = base[:, 3:6] + pred[:, 3:6]
    rot_ref[...] = base[:, 6:10] + pred[:, 6:10]
    lbs_ref[...] = pred[:, GAUSSIAN_DIM:OUT_DIM]


def deformer_head(gl_feats, pose_proj, packed, *, tm=8192):
    """gl_feats: (N, 38) bf16, pose_proj: (B, 64) f32 ->
       (xyz (B,N,3), scale (B,N,3), rot (B,N,4), lbs_off (B,N,24)) all f32."""
    N = gl_feats.shape[0]
    B = pose_proj.shape[0]

    if N <= tm:
        tm_eff, nb = N, 1                  # single block == full array dims (always legal)
    else:
        tm_eff = max(8, (min(tm, N) // 8) * 8)
        nb = pl.cdiv(N, tm_eff)

    n_pad = nb * tm_eff
    if n_pad != N:
        # Tiny input pad so the streamed tile never reads garbage; the output
        # edge-block writes past N are masked by Pallas (no output padding pass).
        gl_feats = jnp.pad(gl_feats, ((0, n_pad - N), (0, 0)))

    pose_proj = pose_proj.astype(jnp.float32)

    cost = pl.CostEstimate(
        flops=2 * B * N * HIDDEN_DIM * (GL_DIM + HIDDEN_DIM + OUT_DIM),
        transcendentals=2 * B * N,
        bytes_accessed=(n_pad * GL_DIM * 2                       # gl tile (bf16, read once)
                        + B * HIDDEN_DIM * 4                     # pose table
                        + B * N * (3 + 3 + 4 + LBS_DIM) * 4      # f32 outputs
                        + HIDDEN_DIM * (GL_DIM + HIDDEN_DIM + OUT_DIM) * 2),
    )

    grid_spec = pltpu.PrefetchScalarGridSpec(
        num_scalar_prefetch=0,
        grid=(nb, B),                      # row tiles outer -> gl tile fetched once per i
        in_specs=[
            pl.BlockSpec((tm_eff, GL_DIM), lambda i, b: (i, 0)),         # gl tile
            pl.BlockSpec((B, HIDDEN_DIM), lambda i, b: (0, 0)),          # pose table
            pl.BlockSpec((GL_DIM, HIDDEN_DIM), lambda i, b: (0, 0)),     # W_gl
            pl.BlockSpec((5, HIDDEN_DIM), lambda i, b: (0, 0)),          # LN params + b2
            pl.BlockSpec((HIDDEN_DIM, HIDDEN_DIM), lambda i, b: (0, 0)),  # W2
            pl.BlockSpec((HIDDEN_DIM, OUT_DIM), lambda i, b: (0, 0)),    # W3
            pl.BlockSpec((1, OUT_DIM), lambda i, b: (0, 0)),             # b3
        ],
        out_specs=[
            pl.BlockSpec((None, tm_eff, 3), lambda i, b: (b, i, 0)),
            pl.BlockSpec((None, tm_eff, 3), lambda i, b: (b, i, 0)),
            pl.BlockSpec((None, tm_eff, 4), lambda i, b: (b, i, 0)),
            pl.BlockSpec((None, tm_eff, LBS_DIM), lambda i, b: (b, i, 0)),
        ],
    )

    xyz_d, scale_d, rot_d, lbs_off = pl.pallas_call(
        deformer_kernel,
        out_shape=[
            jax.ShapeDtypeStruct((B, N, 3), jnp.float32),
            jax.ShapeDtypeStruct((B, N, 3), jnp.float32),
            jax.ShapeDtypeStruct((B, N, 4), jnp.float32),
            jax.ShapeDtypeStruct((B, N, LBS_DIM), jnp.float32),
        ],
        grid_spec=grid_spec,
        compiler_params=pltpu.CompilerParams(
            dimension_semantics=("parallel", "arbitrary"),   # nb sharded on v7x megacore
            vmem_limit_bytes=48 * 1024 * 1024,               # v7x-safe, overrides v5e's 16 MiB
        ),
        cost_estimate=cost,
    )(gl_feats, pose_proj, packed["w_gl"], packed["vec"], packed["w2"],
      packed["w3"], packed["b3"])
    return xyz_d, scale_d, rot_d, lbs_off


def prepare_packed_params(params):
    """Fold the stand-in encoder linear into the first predictor linear and pack
    the remaining tiny parameters into kernel-friendly operands."""
    w_fused = params["we"] @ params["w1"]                       # (113, 64)
    b_fused = params["be"] @ params["w1"] + params["b1"]        # (1, 64)
    vec = jnp.concatenate(
        [params["g1"], params["bt1"], params["b2"], params["g2"],
         params["bt2"]], axis=0).astype(jnp.float32)            # (5, 64)
    return {
        "w_gl": w_fused[:GL_DIM].astype(jnp.bfloat16),          # (38, 64) in-kernel
        "w_pose": w_fused[GL_DIM:].astype(jnp.float32),         # (75, 64) host-side tiny matmul
        "b_fused": b_fused.astype(jnp.float32),                 # (1, 64)
        "vec": vec,
        "w2": params["w2"].astype(jnp.bfloat16),                # (64, 64)
        "w3": params["w3"].astype(jnp.bfloat16),                # (64, 38)
        "b3": params["b3"].astype(jnp.float32),                 # (1, 38)
    }


def init_params(key):
    ks = jax.random.split(key, 8)

    def lin_w(k, fan_in, fan_out):
        s = 1.0 / jnp.sqrt(fan_in)
        return jax.random.uniform(k, (fan_in, fan_out), jnp.float32, -s, s)

    def lin_b(k, fan_in, fan_out):
        s = 1.0 / jnp.sqrt(fan_in)
        return jax.random.uniform(k, (1, fan_out), jnp.float32, -s, s)

    return {
        # TODO(synk): PointTransformerV3 (self.graph_encoder) is an external
        # module whose definition is not provided; the stand-in is a single
        # in_channels -> hidden linear projection.  The we@w1 fold in
        # prepare_packed_params is exact only for this linear stand-in and must
        # be dropped once the real (nonlinear) encoder is plugged in.
        "we": lin_w(ks[0], IN_CHANNELS, HIDDEN_DIM),
        "be": lin_b(ks[1], IN_CHANNELS, HIDDEN_DIM),
        "w1": lin_w(ks[2], HIDDEN_DIM, HIDDEN_DIM),
        "b1": lin_b(ks[3], HIDDEN_DIM, HIDDEN_DIM),
        "g1": jnp.ones((1, HIDDEN_DIM), jnp.float32),
        "bt1": jnp.zeros((1, HIDDEN_DIM), jnp.float32),
        "w2": lin_w(ks[4], HIDDEN_DIM, HIDDEN_DIM),
        "b2": lin_b(ks[5], HIDDEN_DIM, HIDDEN_DIM),
        "g2": jnp.ones((1, HIDDEN_DIM), jnp.float32),
        "bt2": jnp.zeros((1, HIDDEN_DIM), jnp.float32),
        "w3": lin_w(ks[6], HIDDEN_DIM, OUT_DIM),
        "b3": lin_b(ks[7], HIDDEN_DIM, OUT_DIM),
    }


@functools.partial(jax.jit, static_argnames=("tm",))
def gaussian_deformer_forward(gaussians, pose, lbs_weights, params, tm=8192):
    """Mirrors GaussianDeformer.forward.

    gaussians: dict of (N, d) arrays; pose: (B, 75); lbs_weights: (N, 24).
    Returns (combined_deformed_gs, all_lbs_offsets): per-key (B, N, d) and (B, N, 24).
    """
    B = pose.shape[0]
    N = gaussians["xyz"].shape[0]

    packed = prepare_packed_params(params)

    gaussian_feats = jnp.concatenate(
        [gaussians["xyz"], gaussians["scale"], gaussians["rot"],
         gaussians["opacity"], gaussians["color"]], axis=-1)           # (N, 14)
    gl_feats = jnp.concatenate(
        [gaussian_feats, lbs_weights], axis=-1).astype(jnp.bfloat16)   # (N, 38)

    # Per-pose half of the fused first linear (tiny: B x 75 @ 75 x 64).
    pose_proj = pose.astype(jnp.float32) @ packed["w_pose"] + packed["b_fused"]

    xyz_d, scale_d, rot_d, lbs_off = deformer_head(
        gl_feats, pose_proj, packed, tm=tm)

    # Matches the reference: opacity/color offsets are predicted but not applied.
    combined_deformed_gs = {
        "xyz": xyz_d,
        "scale": scale_d,
        "rot": rot_d,
        "opacity": jnp.broadcast_to(gaussians["opacity"][None], (B, N, 1)),
        "color": jnp.broadcast_to(gaussians["color"][None], (B, N, COLOR_DIM)),
    }
    return combined_deformed_gs, lbs_off


def _reference_offset_pred(gaussians, pose, lbs_weights, params):
    """Plain-JAX f32 reference of the (stand-in encoder + offset_predictor)."""
    B = pose.shape[0]
    N = gaussians["xyz"].shape[0]
    gaussian_feats = jnp.concatenate(
        [gaussians["xyz"], gaussians["scale"], gaussians["rot"],
         gaussians["opacity"], gaussians["color"]], axis=-1)
    gfeat_b = jnp.broadcast_to(gaussian_feats[None], (B, N, GAUSSIAN_DIM))
    lbs_b = jnp.broadcast_to(lbs_weights[None], (B, N, LBS_DIM))
    pose_b = jnp.broadcast_to(pose[:, None, :], (B, N, POSE_DIM))
    feats = jnp.concatenate([gfeat_b, lbs_b, pose_b], axis=-1).astype(jnp.float32)
    h = feats @ params["we"] + params["be"]
    h = h @ params["w1"] + params["b1"]
    h = _leaky_relu(_layernorm(h, params["g1"], params["bt1"]))
    h = h @ params["w2"] + params["b2"]
    h = _leaky_relu(_layernorm(h, params["g2"], params["bt2"]))
    return h @ params["w3"] + params["b3"]


def _make_inputs(key, B, N):
    k_g, k_p, k_l = jax.random.split(key, 3)
    kx, ks, kr, ko, kc = jax.random.split(k_g, 5)
    gaussians = {
        "xyz": jax.random.normal(kx, (N, 3), jnp.float32),
        "scale": jax.random.normal(ks, (N, 3), jnp.float32) * 0.1,
        "rot": jax.random.normal(kr, (N, 4), jnp.float32),
        "opacity": jax.random.uniform(ko, (N, 1), jnp.float32),
        "color": jax.random.uniform(kc, (N, 3), jnp.float32),
    }
    pose = jax.random.normal(k_p, (B, POSE_DIM), jnp.float32)
    lbs_weights = jax.nn.softmax(
        jax.random.normal(k_l, (N, LBS_DIM), jnp.float32), axis=-1)
    return gaussians, pose, lbs_weights


def _check(gaussians, pose, lbs_weights, params, deformed, lbs_offsets, tol=0.2):
    ref_pred = _reference_offset_pred(gaussians, pose, lbs_weights, params)
    ref_xyz = gaussians["xyz"][None] + ref_pred[..., 0:3] / 10.0
    ref_scale = gaussians["scale"][None] + ref_pred[..., 3:6]
    ref_rot = gaussians["rot"][None] + ref_pred[..., 6:10]
    errs = [
        float(jnp.max(jnp.abs(deformed["xyz"] - ref_xyz))),
        float(jnp.max(jnp.abs(deformed["scale"] - ref_scale))),
        float(jnp.max(jnp.abs(deformed["rot"] - ref_rot))),
        float(jnp.max(jnp.abs(lbs_offsets - ref_pred[..., GAUSSIAN_DIM:]))),
    ]
    assert bool(jnp.all(jnp.isfinite(lbs_offsets)))
    assert bool(jnp.all(jnp.isfinite(deformed["xyz"])))
    assert max(errs) < tol, f"kernel vs reference max abs err = {max(errs)}"


if __name__ == "__main__":
    key = jax.random.PRNGKey(0)
    k_in, k_w, k_in2 = jax.random.split(key, 3)
    params = init_params(k_w)

    # Config 1: small, single-tile.
    B, N = 2, 128
    gaussians, pose, lbs_weights = _make_inputs(k_in, B, N)
    deformed, lbs_offsets = gaussian_deformer_forward(
        gaussians, pose, lbs_weights, params)
    jax.block_until_ready((deformed, lbs_offsets))

    assert deformed["xyz"].shape == (B, N, 3)
    assert deformed["scale"].shape == (B, N, 3)
    assert deformed["rot"].shape == (B, N, 4)
    assert deformed["opacity"].shape == (B, N, 1)
    assert deformed["color"].shape == (B, N, COLOR_DIM)
    assert lbs_offsets.shape == (B, N, LBS_DIM)
    _check(gaussians, pose, lbs_weights, params, deformed, lbs_offsets)

    # Config 2: multiple row tiles with a partial tail tile (N % tm != 0),
    # exercising the masked edge-write path.
    B2, N2 = 2, 200
    gaussians2, pose2, lbs_weights2 = _make_inputs(k_in2, B2, N2)
    deformed2, lbs_offsets2 = gaussian_deformer_forward(
        gaussians2, pose2, lbs_weights2, params, tm=64)
    jax.block_until_ready((deformed2, lbs_offsets2))
    assert deformed2["xyz"].shape == (B2, N2, 3)
    assert lbs_offsets2.shape == (B2, N2, LBS_DIM)
    _check(gaussians2, pose2, lbs_weights2, params, deformed2, lbs_offsets2)

    print("KERNEL_OK")
</pallas_src>

<mosaic_0001>
module attributes {stable_mosaic.version = 11 : i64} {
  func.func @deformer_kernel(%arg0: i32, %arg1: i32, %arg2: memref<128x38xbf16, #tpu.memory_space<vmem>>, %arg3: memref<2x64xf32, #tpu.memory_space<vmem>>, %arg4: memref<38x64xbf16, #tpu.memory_space<vmem>>, %arg5: memref<5x64xf32, #tpu.memory_space<vmem>>, %arg6: memref<64x64xbf16, #tpu.memory_space<vmem>>, %arg7: memref<64x38xbf16, #tpu.memory_space<vmem>>, %arg8: memref<1x38xf32, #tpu.memory_space<vmem>>, %arg9: memref<1x128x3xf32, #tpu.memory_space<vmem>>, %arg10: memref<1x128x3xf32, #tpu.memory_space<vmem>>, %arg11: memref<1x128x4xf32, #tpu.memory_space<vmem>>, %arg12: memref<1x128x24xf32, #tpu.memory_space<vmem>>) attributes {dimension_semantics = [#tpu.dimension_semantics<parallel>, #tpu.dimension_semantics<arbitrary>], iteration_bounds = array<i64: 1, 2>, scalar_prefetch = 0 : i64, scratch_operands = 0 : i64, tpu.core_type = #tpu.core_type<tc>, window_params = [{transform_indices = @transform_0, window_bounds = array<i64: 128, 38>}, {pipeline_mode = #tpu.pipeline_mode<synchronous>, transform_indices = @transform_1, window_bounds = array<i64: 2, 64>}, {pipeline_mode = #tpu.pipeline_mode<synchronous>, transform_indices = @transform_2, window_bounds = array<i64: 38, 64>}, {pipeline_mode = #tpu.pipeline_mode<synchronous>, transform_indices = @transform_3, window_bounds = array<i64: 5, 64>}, {pipeline_mode = #tpu.pipeline_mode<synchronous>, transform_indices = @transform_4, window_bounds = array<i64: 64, 64>}, {pipeline_mode = #tpu.pipeline_mode<synchronous>, transform_indices = @transform_5, window_bounds = array<i64: 64, 38>}, {pipeline_mode = #tpu.pipeline_mode<synchronous>, transform_indices = @transform_6, window_bounds = array<i64: 1, 38>}, {transform_indices = @transform_7, window_bounds = array<i64: 1, 128, 3>}, {transform_indices = @transform_8, window_bounds = array<i64: 1, 128, 3>}, {transform_indices = @transform_9, window_bounds = array<i64: 1, 128, 4>}, {transform_indices = @transform_10, window_bounds = array<i64: 1, 128, 24>}]} {
    %c0 = arith.constant 0 : index
    %c0_0 = arith.constant 0 : index
    %0 = vector.load %arg2[%c0, %c0_0] : memref<128x38xbf16, #tpu.memory_space<vmem>>, vector<128x38xbf16>
    %c0_1 = arith.constant 0 : index
    %c0_2 = arith.constant 0 : index
    %1 = vector.load %arg4[%c0_1, %c0_2] : memref<38x64xbf16, #tpu.memory_space<vmem>>, vector<38x64xbf16>
    %cst = arith.constant dense<0.000000e+00> : vector<128x64xf32>
    %2 = tpu.matmul %0, %1, %cst {dimension_numbers = #tpu.dot_dimension_numbers<[1], [0], [0], [1], [0, 0, 1, 1], [], []>} : vector<128x38xbf16>, vector<38x64xbf16>, vector<128x64xf32> -> vector<128x64xf32>
    %3 = arith.index_cast %arg1 : i32 to index
    %c0_3 = arith.constant 0 : index
    %4 = vector.load %arg3[%3, %c0_3] : memref<2x64xf32, #tpu.memory_space<vmem>>, vector<1x64xf32>
    %5 = vector.broadcast %4 : vector<1x64xf32> to vector<128x64xf32>
    %6 = arith.addf %2, %5 : vector<128x64xf32>
    %c0_4 = arith.constant 0 : index
    %c0_5 = arith.constant 0 : index
    %7 = vector.load %arg5[%c0_4, %c0_5] : memref<5x64xf32, #tpu.memory_space<vmem>>, vector<1x64xf32>
    %c1 = arith.constant 1 : index
    %c0_6 = arith.constant 0 : index
    %8 = vector.load %arg5[%c1, %c0_6] : memref<5x64xf32, #tpu.memory_space<vmem>>, vector<1x64xf32>
    %cst_7 = arith.constant dense<0.000000e+00> : vector<128xf32>
    %9 = vector.multi_reduction <add>, %6, %cst_7 [1] : vector<128x64xf32> to vector<128xf32>
    %10 = vector.shape_cast %9 : vector<128xf32> to vector<128x1xf32>
    %cst_8 = arith.constant 6.400000e+01 : f32
    %11 = vector.broadcast %cst_8 : f32 to vector<128x1xf32>
    %12 = arith.divf %10, %11 : vector<128x1xf32>
    %13 = vector.broadcast %12 : vector<128x1xf32> to vector<128x64xf32>
    %14 = arith.subf %6, %13 : vector<128x64xf32>
    %15 = arith.mulf %14, %14 : vector<128x64xf32>
    %cst_9 = arith.constant dense<0.000000e+00> : vector<128xf32>
    %16 = vector.multi_reduction <add>, %15, %cst_9 [1] : vector<128x64xf32> to vector<128xf32>
    %17 = vector.shape_cast %16 : vector<128xf32> to vector<128x1xf32>
    %cst_10 = arith.constant 6.400000e+01 : f32
    %18 = vector.broadcast %cst_10 : f32 to vector<128x1xf32>
    %19 = arith.divf %17, %18 : vector<128x1xf32>
    %cst_11 = arith.constant 9.99999974E-6 : f32
    %20 = vector.broadcast %cst_11 : f32 to vector<128x1xf32>
    %21 = arith.addf %19, %20 : vector<128x1xf32>
    %22 = math.rsqrt %21 : vector<128x1xf32>
    %23 = vector.broadcast %22 : vector<128x1xf32> to vector<128x64xf32>
    %24 = arith.mulf %14, %23 : vector<128x64xf32>
    %25 = vector.broadcast %7 : vector<1x64xf32> to vector<128x64xf32>
    %26 = arith.mulf %24, %25 : vector<128x64xf32>
    %27 = vector.broadcast %8 : vector<1x64xf32> to vector<128x64xf32>
    %28 = arith.addf %26, %27 : vector<128x64xf32>
    %cst_12 = arith.constant 0.000000e+00 : f32
    %29 = vector.broadcast %cst_12 : f32 to vector<128x64xf32>
    %30 = arith.cmpf ogt, %28, %29 : vector<128x64xf32>
    %cst_13 = arith.constant 2.000000e-01 : f32
    %31 = vector.broadcast %cst_13 : f32 to vector<128x64xf32>
    %32 = arith.mulf %31, %28 : vector<128x64xf32>
    %33 = arith.select %30, %28, %32 : vector<128x64xi1>, vector<128x64xf32>
    %34 = arith.truncf %33 : vector<128x64xf32> to vector<128x64xbf16>
    %c0_14 = arith.constant 0 : index
    %c0_15 = arith.constant 0 : index
    %35 = vector.load %arg6[%c0_14, %c0_15] : memref<64x64xbf16, #tpu.memory_space<vmem>>, vector<64x64xbf16>
    %cst_16 = arith.constant dense<0.000000e+00> : vector<128x64xf32>
    %36 = tpu.matmul %34, %35, %cst_16 {dimension_numbers = #tpu.dot_dimension_numbers<[1], [0], [0], [1], [0, 0, 1, 1], [], []>} : vector<128x64xbf16>, vector<64x64xbf16>, vector<128x64xf32> -> vector<128x64xf32>
    %c2 = arith.constant 2 : index
    %c0_17 = arith.constant 0 : index
    %37 = vector.load %arg5[%c2, %c0_17] : memref<5x64xf32, #tpu.memory_space<vmem>>, vector<1x64xf32>
    %38 = vector.broadcast %37 : vector<1x64xf32> to vector<128x64xf32>
    %39 = arith.addf %36, %38 : vector<128x64xf32>
    %c3 = arith.constant 3 : index
    %c0_18 = arith.constant 0 : index
    %40 = vector.load %arg5[%c3, %c0_18] : memref<5x64xf32, #tpu.memory_space<vmem>>, vector<1x64xf32>
    %c4 = arith.constant 4 : index
    %c0_19 = arith.constant 0 : index
    %41 = vector.load %arg5[%c4, %c0_19] : memref<5x64xf32, #tpu.memory_space<vmem>>, vector<1x64xf32>
    %cst_20 = arith.constant dense<0.000000e+00> : vector<128xf32>
    %42 = vector.multi_reduction <add>, %39, %cst_20 [1] : vector<128x64xf32> to vector<128xf32>
    %43 = vector.shape_cast %42 : vector<128xf32> to vector<128x1xf32>
    %cst_21 = arith.constant 6.400000e+01 : f32
    %44 = vector.broadcast %cst_21 : f32 to vector<128x1xf32>
    %45 = arith.divf %43, %44 : vector<128x1xf32>
    %46 = vector.broadcast %45 : vector<128x1xf32> to vector<128x64xf32>
    %47 = arith.subf %39, %46 : vector<128x64xf32>
    %48 = arith.mulf %47, %47 : vector<128x64xf32>
    %cst_22 = arith.constant dense<0.000000e+00> : vector<128xf32>
    %49 = vector.multi_reduction <add>, %48, %cst_22 [1] : vector<128x64xf32> to vector<128xf32>
    %50 = vector.shape_cast %49 : vector<128xf32> to vector<128x1xf32>
    %cst_23 = arith.constant 6.400000e+01 : f32
    %51 = vector.broadcast %cst_23 : f32 to vector<128x1xf32>
    %52 = arith.divf %50, %51 : vector<128x1xf32>
    %cst_24 = arith.constant 9.99999974E-6 : f32
    %53 = vector.broadcast %cst_24 : f32 to vector<128x1xf32>
    %54 = arith.addf %52, %53 : vector<128x1xf32>
    %55 = math.rsqrt %54 : vector<128x1xf32>
    %56 = vector.broadcast %55 : vector<128x1xf32> to vector<128x64xf32>
    %57 = arith.mulf %47, %56 : vector<128x64xf32>
    %58 = vector.broadcast %40 : vector<1x64xf32> to vector<128x64xf32>
    %59 = arith.mulf %57, %58 : vector<128x64xf32>
    %60 = vector.broadcast %41 : vector<1x64xf32> to vector<128x64xf32>
    %61 = arith.addf %59, %60 : vector<128x64xf32>
    %cst_25 = arith.constant 0.000000e+00 : f32
    %62 = vector.broadcast %cst_25 : f32 to vector<128x64xf32>
    %63 = arith.cmpf ogt, %61, %62 : vector<128x64xf32>
    %cst_26 = arith.constant 2.000000e-01 : f32
    %64 = vector.broadcast %cst_26 : f32 to vector<128x64xf32>
    %65 = arith.mulf %64, %61 : vector<128x64xf32>
    %66 = arith.select %63, %61, %65 : vector<128x64xi1>, vector<128x64xf32>
    %67 = arith.truncf %66 : vector<128x64xf32> to vector<128x64xbf16>
    %c0_27 = arith.constant 0 : index
    %c0_28 = arith.constant 0 : index
    %68 = vector.load %arg7[%c0_27, %c0_28] : memref<64x38xbf16, #tpu.memory_space<vmem>>, vector<64x38xbf16>
    %cst_29 = arith.constant dense<0.000000e+00> : vector<128x38xf32>
    %69 = tpu.matmul %67, %68, %cst_29 {dimension_numbers = #tpu.dot_dimension_numbers<[1], [0], [0], [1], [0, 0, 1, 1], [], []>} : vector<128x64xbf16>, vector<64x38xbf16>, vector<128x38xf32> -> vector<128x38xf32>
    %c0_30 = arith.constant 0 : index
    %c0_31 = arith.constant 0 : index
    %70 = vector.load %arg8[%c0_30, %c0_31] : memref<1x38xf32, #tpu.memory_space<vmem>>, vector<1x38xf32>
    %71 = vector.broadcast %70 : vector<1x38xf32> to vector<128x38xf32>
    %72 = arith.addf %69, %71 : vector<128x38xf32>
    %73 = arith.extf %0 : vector<128x38xbf16> to vector<128x38xf32>
    %74 = vector.extract_strided_slice %73 {offsets = [0, 0], sizes = [128, 3], strides = [1, 1]} : vector<128x38xf32> to vector<128x3xf32>
    %75 = vector.extract_strided_slice %72 {offsets = [0, 0], sizes = [128, 3], strides = [1, 1]} : vector<128x38xf32> to vector<128x3xf32>
    %cst_32 = arith.constant 1.000000e-01 : f32
    %76 = vector.broadcast %cst_32 : f32 to vector<128x3xf32>
    %77 = arith.mulf %75, %76 : vector<128x3xf32>
    %78 = arith.addf %74, %77 : vector<128x3xf32>
    %c0_33 = arith.constant 0 : index
    %c0_34 = arith.constant 0 : index
    %c0_35 = arith.constant 0 : index
    %79 = vector.load %arg9[%c0_33, %c0_34, %c0_35] : memref<1x128x3xf32, #tpu.memory_space<vmem>>, vector<1x128x3xf32>
    %80 = vector.shape_cast %79 : vector<1x128x3xf32> to vector<128x3xf32>
    %81 = vector.shape_cast %78 : vector<128x3xf32> to vector<1x128x3xf32>
    tpu.vector_store %arg9[%c0_33, %c0_34, %c0_35], %81 {strides = array<i32>} : memref<1x128x3xf32, #tpu.memory_space<vmem>>, vector<1x128x3xf32>,
    %82 = vector.extract_strided_slice %73 {offsets = [0, 3], sizes = [128, 3], strides = [1, 1]} : vector<128x38xf32> to vector<128x3xf32>
    %83 = vector.extract_strided_slice %72 {offsets = [0, 3], sizes = [128, 3], strides = [1, 1]} : vector<128x38xf32> to vector<128x3xf32>
    %84 = arith.addf %82, %83 : vector<128x3xf32>
    %c0_36 = arith.constant 0 : index
    %c0_37 = arith.constant 0 : index
    %c0_38 = arith.constant 0 : index
    %85 = vector.load %arg10[%c0_36, %c0_37, %c0_38] : memref<1x128x3xf32, #tpu.memory_space<vmem>>, vector<1x128x3xf32>
    %86 = vector.shape_cast %85 : vector<1x128x3xf32> to vector<128x3xf32>
    %87 = vector.shape_cast %84 : vector<128x3xf32> to vector<1x128x3xf32>
    tpu.vector_store %arg10[%c0_36, %c0_37, %c0_38], %87 {strides = array<i32>} : memref<1x128x3xf32, #tpu.memory_space<vmem>>, vector<1x128x3xf32>,
    %88 = vector.extract_strided_slice %73 {offsets = [0, 6], sizes = [128, 4], strides = [1, 1]} : vector<128x38xf32> to vector<128x4xf32>
    %89 = vector.extract_strided_slice %72 {offsets = [0, 6], sizes = [128, 4], strides = [1, 1]} : vector<128x38xf32> to vector<128x4xf32>
    %90 = arith.addf %88, %89 : vector<128x4xf32>
    %c0_39 = arith.constant 0 : index
    %c0_40 = arith.constant 0 : index
    %c0_41 = arith.constant 0 : index
    %91 = vector.load %arg11[%c0_39, %c0_40, %c0_41] : memref<1x128x4xf32, #tpu.memory_space<vmem>>, vector<1x128x4xf32>
    %92 = vector.shape_cast %91 : vector<1x128x4xf32> to vector<128x4xf32>
    %93 = vector.shape_cast %90 : vector<128x4xf32> to vector<1x128x4xf32>
    tpu.vector_store %arg11[%c0_39, %c0_40, %c0_41], %93 {strides = array<i32>} : memref<1x128x4xf32, #tpu.memory_space<vmem>>, vector<1x128x4xf32>,
    %94 = vector.extract_strided_slice %72 {offsets = [0, 14], sizes = [128, 24], strides = [1, 1]} : vector<128x38xf32> to vector<128x24xf32>
    %c0_42 = arith.constant 0 : index
    %c0_43 = arith.constant 0 : index
    %c0_44 = arith.constant 0 : index
    %95 = vector.load %arg12[%c0_42, %c0_43, %c0_44] : memref<1x128x24xf32, #tpu.memory_space<vmem>>, vector<1x128x24xf32>
    %96 = vector.shape_cast %95 : vector<1x128x24xf32> to vector<128x24xf32>
    %97 = vector.shape_cast %94 : vector<128x24xf32> to vector<1x128x24xf32>
    tpu.vector_store %arg12[%c0_42, %c0_43, %c0_44], %97 {strides = array<i32>} : memref<1x128x24xf32, #tpu.memory_space<vmem>>, vector<1x128x24xf32>,
    return
  }
  func.func @transform_0(%arg0: i32, %arg1: i32) -> (i32, i32) {
    %c0_i32 = arith.constant 0 : i32
    %c0_i32_0 = arith.constant 0 : i32
    return %arg0, %c0_i32 : i32, i32
  }
  func.func @transform_1(%arg0: i32, %arg1: i32) -> (i32, i32) {
    %c0_i32 = arith.constant 0 : i32
    %c0_i32_0 = arith.constant 0 : i32
    %c0_i32_1 = arith.constant 0 : i32
    return %c0_i32, %c0_i32_0 : i32, i32
  }
  func.func @transform_2(%arg0: i32, %arg1: i32) -> (i32, i32) {
    %c0_i32 = arith.constant 0 : i32
    %c0_i32_0 = arith.constant 0 : i32
    %c0_i32_1 = arith.constant 0 : i32
    return %c0_i32, %c0_i32_0 : i32, i32
  }
  func.func @transform_3(%arg0: i32, %arg1: i32) -> (i32, i32) {
    %c0_i32 = arith.constant 0 : i32
    %c0_i32_0 = arith.constant 0 : i32
    %c0_i32_1 = arith.constant 0 : i32
    return %c0_i32, %c0_i32_0 : i32, i32
  }
  func.func @transform_4(%arg0: i32, %arg1: i32) -> (i32, i32) {
    %c0_i32 = arith.constant 0 : i32
    %c0_i32_0 = arith.constant 0 : i32
    %c0_i32_1 = arith.constant 0 : i32
    return %c0_i32, %c0_i32_0 : i32, i32
  }
  func.func @transform_5(%arg0: i32, %arg1: i32) -> (i32, i32) {
    %c0_i32 = arith.constant 0 : i32
    %c0_i32_0 = arith.constant 0 : i32
    %c0_i32_1 = arith.constant 0 : i32
    return %c0_i32, %c0_i32_0 : i32, i32
  }
  func.func @transform_6(%arg0: i32, %arg1: i32) -> (i32, i32) {
    %c0_i32 = arith.constant 0 : i32
    %c0_i32_0 = arith.constant 0 : i32
    %c0_i32_1 = arith.constant 0 : i32
    return %c0_i32, %c0_i32_0 : i32, i32
  }
  func.func @transform_7(%arg0: i32, %arg1: i32) -> (i32, i32, i32) {
    %c0_i32 = arith.constant 0 : i32
    %c0_i32_0 = arith.constant 0 : i32
    return %arg1, %arg0, %c0_i32 : i32, i32, i32
  }
  func.func @transform_8(%arg0: i32, %arg1: i32) -> (i32, i32, i32) {
    %c0_i32 = arith.constant 0 : i32
    %c0_i32_0 = arith.constant 0 : i32
    return %arg1, %arg0, %c0_i32 : i32, i32, i32
  }
  func.func @transform_9(%arg0: i32, %arg1: i32) -> (i32, i32, i32) {
    %c0_i32 = arith.constant 0 : i32
    %c0_i32_0 = arith.constant 0 : i32
    return %arg1, %arg0, %c0_i32 : i32, i32, i32
  }
  func.func @transform_10(%arg0: i32, %arg1: i32) -> (i32, i32, i32) {
    %c0_i32 = arith.constant 0 : i32
    %c0_i32_0 = arith.constant 0 : i32
    return %arg1, %arg0, %c0_i32 : i32, i32, i32
  }
}

</mosaic_0001>

<bundles_post_ra>
// kernel: gaussian_deformer_forward.1
= control target key start
LH: loop header
LB: loop body
LE: loop exit
PB: predicated region body
PF: predicated region fallthrough
CT: control target
= control target key end

     0   :  { %s2528_s13 = smov 0   ;;  %s2530_s14 = smov 0   ;;  %s3422_s0 = inlined_call_operand.vmem [shape: bf16[128,38], index: 0, kind: input, shape index: {}]   ;;  %s3423_s1 = inlined_call_operand.vmem [shape: f32[2,64], index: 1, kind: input, shape index: {}]   ;;  %s3424_s2 = inlined_call_operand.vmem [shape: bf16[38,64], index: 2, kind: input, shape index: {}]   ;;  %s3425_s3 = inlined_call_operand.vmem [shape: f32[5,64], index: 3, kind: input, shape index: {}]   ;;  %s3426_s4 = inlined_call_operand.vmem [shape: bf16[64,64], index: 4, kind: input, shape index: {}]   ;;  %s3427_s5 = inlined_call_operand.vmem [shape: bf16[64,38], index: 5, kind: input, shape index: {}]   ;;  %s3428_s6 = inlined_call_operand.vmem [shape: f32[1,38], index: 6, kind: input, shape index: {}]   ;;  %s3429_s7 = inlined_call_operand.vmem [shape: f32[2,128,3], index: 7, kind: output, shape index: {0}]   ;;  %s3430_s8 = inlined_call_operand.vmem [shape: f32[2,128,3], index: 8, kind: output, shape index: {1}]   ;;  %s3431_s9 = inlined_call_operand.vmem [shape: f32[2,128,4], index: 9, kind: output, shape index: {2}]   ;;  %s3432_s10 = inlined_call_operand.vmem [shape: f32[2,128,24], index: 10, kind: output, shape index: {3}]  }
   0x1   :  { %s2532_s15 = smov 0  }
   0x2 LB: > { %s30_s16 = sadd.s32 1, %s2464_s14  ;;  %p2142_p0 = scmp.ge.s32.totalorder %s2468_s15, 1  ;;  %s2468_s15 = sphi %s2532_s15, %s21_s15   ;;  %s2464_s14 = sphi %s2530_s14, %s3434_s14   ;;  %s2460_s13 = sphi %s2528_s13, %s3433_s13  }
   0x3   : > { %p31_p1 = scmp.ge.s32.totalorder %s30_s16, 2  ;;  %p340_p2 = scmp.lt.s32.totalorder %s2468_s15, 3 }
   0x5   : > { %s3436_s16 = smov (%p31_p1, %s30_s16), 0  ;;  %p341_p3 = pnand %p2142_p0, %p340_p2 }
   0x6   : > { %s477_s25 = scalar_lea.vmem (!%p341_p3), %s3423_s1, %s2460_s13  ;;  %p416_p4 = scmp.lt.s32.totalorder (!%p341_p3), %s2460_s13, 1 }
   0x7   : > { %344 = sbr.rel (%p341_p3) target bundleno = 1472 (0x5c0), region = 48  ;;  %s2471_s30 = smov (!%p341_p3), 125  }
   0x8   : > { %s2472_s11 = smov (!%p341_p3), 122  }
   0xc   : > { %v2347_v0 = vld [vmem:[%s3424_s2 + $0x10] ss:$0 sps:$4 sm:$0x77]   ;;  %vm563_vm0 = vcmask 1042432   ;;  %v2348_v1 = vld [vmem:[%s3424_s2 + $0x8] sm:$0xff]   ;;  %v456_v3 = vld [vmem:[%s3422_s0] sm:$0xff]  }
   0xd   : > { %2318 = vmatprep.subr.msk.bf16.mxu0 %vm563_vm0, %v2347_v0  ;;  %v565_v2 = vsel %vm563_vm0, %v2347_v0, 0  ;;  %2319 = vmatprep.subr.msk.bf16.mxu1 %vm563_vm0, %v2347_v0  ;;  %vm538_vm1 = vcmask 310272   ;;  %v2349_v4 = vld [vmem:[%s3424_s2] sm:$0xff]   ;;  %v458_v6 = vld [vmem:[%s3422_s0 + $0x8] sm:$0xff]   ;;  %v460_v8 = vld [vmem:[%s3422_s0 + $0x10] sm:$0xff]   ;;  %vm666_vm2 = vcmask 523264  }
   0xe   : > { %2243 = vmatpush3.bf16.msra.mxu0 %v565_v2  ;;  %2315 = vmatpush3.bf16.msra.mxu1 %v565_v2  ;;  %v464_v5 = vld [vmem:[%s3422_s0 + $0x20] sm:$0xff]   ;;  %v466_v7 = vld [vmem:[%s3422_s0 + $0x28] sm:$0xff]   ;;  %v468_v9 = vld [vmem:[%s3422_s0 + $0x30] sm:$0xff]   ;;  %s3438_s13 = smov (!%p416_p4, %s2460_s13), 1 }
   0xf   : > { %2244 = vmatprep.subr.bf16.mxu0 %v2348_v1  ;;  %2313 = vmatprep.subr.bf16.mxu1 %v2348_v1  ;;  %v462_v10 = vld [vmem:[%s3422_s0 + $0x18] sm:$0xff]   ;;  %v2151_v12 = vld [vmem:[%s477_s25] ss:$0 sm:$0xff]  ;;  %s3077_s24 = sshll.u32 %s3438_s13, 7  ;;  %s2470_s25 = smov 114  }
  0x10   : > { %2248 = vmatprep.mubr.msk.bf16.mxu0 %vm538_vm1, %v456_v3  ;;  %2256 = vmatprep.mubr.msk.bf16.mxu1 %vm538_vm1, %v464_v5  ;;  %v470_v11 = vld [vmem:[%s3422_s0 + $0x38] sm:$0xff]   ;;  %s3085_s28 = scalar_lea.vmem %s3429_s7, %s3077_s24  ;;  %s3303_s17 = scalar_lea.vmem %s3432_s10, %s3077_s24 }
  0x11   : > { %s3309_s20 = scalar_lea.vmem %s3430_s8, %s3077_s24 }
  0x12   : > { %2245 = vmatpush3.bf16.msra.mxu0 %v2348_v1  ;;  %2316 = vmatpush3.bf16.msra.mxu1 %v2348_v1 }
  0x13   : > { %2246 = vmatprep.subr.bf16.mxu0 %v2349_v4  ;;  %2314 = vmatprep.subr.bf16.mxu1 %v2349_v4 }
  0x16   : > { %2247 = vmatpush3.bf16.msra.mxu0 %v2349_v4  ;;  %2317 = vmatpush3.bf16.msra.mxu1 %v2349_v4 }
  0x19   : > { %2249 = vmatmul.mubr.msk.bf16.vlgmr.msra.gmra.mxu0 %vm538_vm1, %v458_v6  ;;  %2257 = vmatmul.mubr.msk.bf16.vlgmr.msra.gmra.mxu1 %vm538_vm1, %v466_v7 }
  0x1a   : > { %2252 = vmatprep.mubr.msk.bf16.mxu0 %vm538_vm1, %v460_v8  ;;  %2260 = vmatprep.mubr.msk.bf16.mxu1 %vm538_vm1, %v468_v9 }
  0x21   : > { %2253 = vmatmul.mubr.msk.bf16.gmra.mxu0 %vm538_vm1, %v462_v10  ;;  %2261 = vmatmul.mubr.msk.bf16.gmra.mxu1 %vm538_vm1, %v470_v11 }
  0xd9   : > { %v2250_v13 = vpop.f32.mrf.mxu0  ;;  %v2258_v14 = vpop.f32.mrf.mxu1 }
  0xda   : > { %v2593_v15 = vadd.f32 %v2250_v13, %v2151_v12  ;;  %v2619_v43 = vadd.f32 %v2258_v14, %v2151_v12 }
  0xdb   : > { %v601_v16 = vpop.f32.mrf.mxu0  ;;  %v633_v17 = vpop.f32.mrf.mxu1 }
  0xdc   : > { %v2595_v18 = vadd.f32 %v2151_v12, %v601_v16  ;;  %v673_v19 = vsel %vm666_vm2, %v2593_v15, 0.0  ;;  %v2613_v39 = vadd.f32 %v2151_v12, %v633_v17  ;;  %v697_v51 = vsel %vm666_vm2, %v2619_v43, 0.0 }
  0xdd   : > { %674 = vadd.xlane.f32.xlu1 %v673_v19  ;;  %v2251_v20 = vpop.f32.mrf.mxu0  ;;  %v2259_v21 = vpop.f32.mrf.mxu1 }
  0xde   : > { %v2599_v22 = vadd.f32 %v2251_v20, %v2151_v12  ;;  %v667_v23 = vsel %vm666_vm2, %v2595_v18, 0.0  ;;  %v691_v46 = vsel %vm666_vm2, %v2613_v39, 0.0  ;;  %v2627_v48 = vadd.f32 %v2259_v21, %v2151_v12 }
  0xdf   : > { %v604_v24 = vpop.f32.mrf.mxu0  ;;  %668 = vadd.xlane.f32.xlu0 %v667_v23  ;;  %v636_v28 = vpop.f32.mrf.mxu1 }
  0xe0   : > { %v605_v25 = vadd.f32 %v2151_v12, %v604_v24  ;;  %v676_v26 = vsel %vm666_vm2, %v2599_v22, 0.0  ;;  %v2621_v44 = vadd.f32 %v2151_v12, %v636_v28  ;;  %v700_v55 = vsel %vm666_vm2, %v2627_v48, 0.0 }
  0xe1   : > { %677 = vadd.xlane.f32.xlu1 %v676_v26  ;;  %v2254_v27 = vpop.f32.mrf.mxu0  ;;  %v2262_v34 = vpop.f32.mrf.mxu1 }
  0xe2   : > { %v670_v29 = vsel %vm666_vm2, %v605_v25, 0.0  ;;  %v2606_v31 = vadd.f32 %v2254_v27, %v2151_v12  ;;  %v694_v50 = vsel %vm666_vm2, %v2621_v44, 0.0  ;;  %v2635_v53 = vadd.f32 %v2262_v34, %v2151_v12 }
  0xe3   : > { %v617_v30 = vpop.f32.mrf.mxu0  ;;  %671 = vadd.xlane.f32.xlu0 %v670_v29  ;;  %v649_v41 = vpop.f32.mrf.mxu1 }
  0xe4   : > { %v618_v32 = vadd.f32 %v2151_v12, %v617_v30  ;;  %v685_v40 = vsel %vm666_vm2, %v2606_v31, 0.0  ;;  %v2629_v49 = vadd.f32 %v2151_v12, %v649_v41  ;;  %v709_v59 = vsel %vm666_vm2, %v2635_v53, 0.0 }
  0xe5   : > { %v2255_v33 = vpop.f32.mrf.mxu0  ;;  %v2263_v47 = vpop.f32.mrf.mxu1 }
  0xe6   : > { %v679_v35 = vsel %vm666_vm2, %v618_v32, 0.0  ;;  %v2609_v37 = vadd.f32 %v2255_v33, %v2151_v12  ;;  %v703_v56 = vsel %vm666_vm2, %v2629_v49, 0.0  ;;  %v2643_v57 = vadd.f32 %v2263_v47, %v2151_v12 }
  0xe7   : > { %v620_v36 = vpop.f32.mrf.mxu0  ;;  %680 = vadd.xlane.f32.xlu0 %v679_v35  ;;  %v652_v52 = vpop.f32.mrf.mxu1 }
  0xe8   : > { %v2611_v38 = vadd.f32 %v2151_v12, %v620_v36  ;;  %v688_v45 = vsel %vm666_vm2, %v2609_v37, 0.0  ;;  %v2637_v54 = vadd.f32 %v2151_v12, %v652_v52  ;;  %v712_v60 = vsel %vm666_vm2, %v2643_v57, 0.0 }
  0xea   : > { %v682_v42 = vsel %vm666_vm2, %v2611_v38, 0.0  ;;  %v706_v58 = vsel %vm666_vm2, %v2637_v54, 0.0 }
  0xeb   : > { %683 = vadd.xlane.f32.xlu1 %v682_v42  ;;  %686 = vadd.xlane.f32.xlu0 %v685_v40 }
  0xef   : > { %689 = vadd.xlane.f32.xlu1 %v688_v45  ;;  %692 = vadd.xlane.f32.xlu0 %v691_v46 }
  0xf3   : > { %695 = vadd.xlane.f32.xlu1 %v694_v50  ;;  %698 = vadd.xlane.f32.xlu0 %v697_v51 }
  0xf7   : > { %701 = vadd.xlane.f32.xlu1 %v700_v55  ;;  %704 = vadd.xlane.f32.xlu0 %v703_v56 }
  0xfb   : > { %707 = vadd.xlane.f32.xlu1 %v706_v58  ;;  %710 = vadd.xlane.f32.xlu0 %v709_v59 }
  0xff   : > { %713 = vadd.xlane.f32.xlu1 %v712_v60 }
 0x166   : > { %v675_v61 = vpop.xlane.xlu1 %674 }
 0x167   : > { %v718_v62 = vmul.f32 0.015625, %v675_v61 }
 0x168   : > { %v669_v63 = vpop.xlane.xlu0 %668 }
 0x169   : > { %v716_v0 = vmul.f32 0.015625, %v669_v63  ;;  %v2652_v2 = vsub.f32 %v2593_v15, %v718_v62 }
 0x16a   : > { %v678_v1 = vpop.xlane.xlu1 %677 }
 0x16b   : > { %v2655_v3 = vsub.f32 %v2595_v18, %v716_v0  ;;  %v719_v4 = vmul.f32 0.015625, %v678_v1  ;;  %v750_v11 = vmul.f32 %v2652_v2, %v2652_v2 }
 0x16c   : > { %v672_v5 = vpop.xlane.xlu0 %671 }
 0x16d   : > { %v717_v6 = vmul.f32 0.015625, %v672_v5  ;;  %v748_v7 = vmul.f32 %v2655_v3, %v2655_v3  ;;  %v2660_v8 = vsub.f32 %v2599_v22, %v719_v4  ;;  %v770_v16 = vsel %vm666_vm2, %v750_v11, 0.0 }
 0x16f   : > { %v2662_v9 = vsub.f32 %v605_v25, %v717_v6  ;;  %v764_v10 = vsel %vm666_vm2, %v748_v7, 0.0  ;;  %v751_v18 = vmul.f32 %v2660_v8, %v2660_v8 }
 0x170   : > { %765 = vadd.xlane.f32.xlu0 %v764_v10  ;;  %v681_v12 = vpop.xlane.xlu0 %680 }
 0x171   : > { %v720_v13 = vmul.f32 0.015625, %v681_v12  ;;  %v749_v14 = vmul.f32 %v2662_v9, %v2662_v9  ;;  %v773_v26 = vsel %vm666_vm2, %v751_v18, 0.0  ;;  %v2358_v18 = vld [vmem:[%s3426_s4 + $0x18] sm:$0xff]  }
 0x172   : > { %2264 = vmatprep.subr.bf16.mxu1 %v2358_v18 }
 0x173   : > { %v2669_v15 = vsub.f32 %v618_v32, %v720_v13  ;;  %v767_v17 = vsel %vm666_vm2, %v749_v14, 0.0  ;;  %2265 = vmatpush3.bf16.msra.mxu1 %v2358_v18 }
 0x174   : > { %v684_v19 = vpop.xlane.xlu1 %683  ;;  %771 = vadd.xlane.f32.xlu0 %v770_v16  ;;  %768 = vadd.xlane.f32.xlu1 %v767_v17  ;;  %v687_v20 = vpop.xlane.xlu0 %686 }
 0x175   : > { %v721_v21 = vmul.f32 0.015625, %v684_v19  ;;  %v722_v22 = vmul.f32 0.015625, %v687_v20  ;;  %v752_v23 = vmul.f32 %v2669_v15, %v2669_v15  ;;  %v2360_v20 = vld [vmem:[%s3426_s4 + $0x8] sm:$0xff]  }
 0x177   : > { %v2678_v24 = vsub.f32 %v2611_v38, %v721_v21  ;;  %v2681_v25 = vsub.f32 %v2606_v31, %v722_v22  ;;  %v776_v27 = vsel %vm666_vm2, %v752_v23, 0.0  ;;  %v2361_v21 = vld [vmem:[%s3426_s4] sm:$0xff]  }
 0x178   : > { %v690_v28 = vpop.xlane.xlu1 %689  ;;  %774 = vadd.xlane.f32.xlu1 %v773_v26  ;;  %777 = vadd.xlane.f32.xlu0 %v776_v27  ;;  %v693_v29 = vpop.xlane.xlu0 %692 }
 0x179   : > { %v723_v30 = vmul.f32 0.015625, %v690_v28  ;;  %v724_v32 = vmul.f32 0.015625, %v693_v29  ;;  %v753_v33 = vmul.f32 %v2678_v24, %v2678_v24  ;;  %v754_v34 = vmul.f32 %v2681_v25, %v2681_v25 }
 0x17b   : > { %v2690_v35 = vsub.f32 %v2609_v37, %v723_v30  ;;  %v2693_v31 = vsub.f32 %v2613_v39, %v724_v32  ;;  %v779_v36 = vsel %vm666_vm2, %v753_v33, 0.0  ;;  %v782_v38 = vsel %vm666_vm2, %v754_v34, 0.0 }
 0x17c   : > { %v696_v40 = vpop.xlane.xlu1 %695  ;;  %780 = vadd.xlane.f32.xlu1 %v779_v36  ;;  %783 = vadd.xlane.f32.xlu0 %v782_v38  ;;  %v699_v41 = vpop.xlane.xlu0 %698 }
 0x17d   : > { %v725_v42 = vmul.f32 0.015625, %v696_v40  ;;  %v726_v45 = vmul.f32 0.015625, %v699_v41  ;;  %v755_v46 = vmul.f32 %v2690_v35, %v2690_v35  ;;  %v756_v37 = vmul.f32 %v2693_v31, %v2693_v31 }
 0x17f   : > { %v2702_v47 = vsub.f32 %v2621_v44, %v725_v42  ;;  %v2705_v39 = vsub.f32 %v2619_v43, %v726_v45  ;;  %v785_v50 = vsel %vm666_vm2, %v755_v46, 0.0  ;;  %v788_v51 = vsel %vm666_vm2, %v756_v37, 0.0 }
 0x180   : > { %v702_v52 = vpop.xlane.xlu1 %701  ;;  %786 = vadd.xlane.f32.xlu1 %v785_v50  ;;  %789 = vadd.xlane.f32.xlu0 %v788_v51  ;;  %v705_v55 = vpop.xlane.xlu0 %704 }
 0x181   : > { %v727_v56 = vmul.f32 0.015625, %v702_v52  ;;  %v728_v58 = vmul.f32 0.015625, %v705_v55  ;;  %v757_v59 = vmul.f32 %v2702_v47, %v2702_v47  ;;  %v758_v44 = vmul.f32 %v2705_v39, %v2705_v39 }
 0x183   : > { %v2714_v60 = vsub.f32 %v2627_v48, %v727_v56  ;;  %v2717_v43 = vsub.f32 %v2629_v49, %v728_v58  ;;  %v791_v61 = vsel %vm666_vm2, %v757_v59, 0.0  ;;  %v794_v62 = vsel %vm666_vm2, %v758_v44, 0.0 }
 0x184   : > { %v708_v63 = vpop.xlane.xlu1 %707  ;;  %792 = vadd.xlane.f32.xlu1 %v791_v61  ;;  %795 = vadd.xlane.f32.xlu0 %v794_v62  ;;  %v711_v0 = vpop.xlane.xlu0 %710  ;;  %v2760_v61 = vld [vmem:[%s3425_s3] ss:$0 sm:$0xff] }
 0x185   : > { %v729_v1 = vmul.f32 0.015625, %v708_v63  ;;  %v730_v4 = vmul.f32 0.015625, %v711_v0  ;;  %v759_v5 = vmul.f32 %v2714_v60, %v2714_v60  ;;  %v760_v48 = vmul.f32 %v2717_v43, %v2717_v43 }
 0x187   : > { %v2726_v6 = vsub.f32 %v2637_v54, %v729_v1  ;;  %v2729_v49 = vsub.f32 %v2635_v53, %v730_v4  ;;  %v797_v7 = vsel %vm666_vm2, %v759_v5, 0.0  ;;  %v800_v10 = vsel %vm666_vm2, %v760_v48, 0.0  ;;  %v2766_v1 = vld [vmem:[%s3425_s3 + $0x1] ss:$0 sm:$0xff] }
 0x188   : > { %v714_v11 = vpop.xlane.xlu1 %713  ;;  %798 = vadd.xlane.f32.xlu1 %v797_v7  ;;  %801 = vadd.xlane.f32.xlu0 %v800_v10 }
 0x189   : > { %v731_v12 = vmul.f32 0.015625, %v714_v11  ;;  %v761_v13 = vmul.f32 %v2726_v6, %v2726_v6  ;;  %v762_v14 = vmul.f32 %v2729_v49, %v2729_v49 }
 0x18b   : > { %v2738_v54 = vsub.f32 %v2643_v57, %v731_v12  ;;  %v803_v53 = vsel %vm666_vm2, %v761_v13, 0.0  ;;  %v806_v16 = vsel %vm666_vm2, %v762_v14, 0.0  ;;  %v2359_v57 = vld [vmem:[%s3426_s4 + $0x10] sm:$0xff]  }
 0x18c   : > { %804 = vadd.xlane.f32.xlu1 %v803_v53  ;;  %807 = vadd.xlane.f32.xlu0 %v806_v16 }
 0x18d   : > { %v763_v17 = vmul.f32 %v2738_v54, %v2738_v54  ;;  %2266 = vmatprep.subr.bf16.mxu1 %v2359_v57 }
 0x18e   : > { %2267 = vmatpush3.bf16.msra.mxu1 %v2359_v57 }
 0x18f   : > { %v809_v19 = vsel %vm666_vm2, %v763_v17, 0.0  ;;  %2268 = vmatprep.subr.bf16.mxu1 %v2360_v20 }
 0x190   : > { %810 = vadd.xlane.f32.xlu1 %v809_v19 }
 0x192   : > { %2269 = vmatpush3.bf16.msra.mxu1 %v2360_v20 }
 0x193   : > { %2270 = vmatprep.subr.bf16.mxu1 %v2361_v21 }
 0x196   : > { %2271 = vmatpush3.bf16.msra.mxu1 %v2361_v21 }
 0x1f9   : > { %v766_v22 = vpop.xlane.xlu0 %765 }
 0x1fa   : > { %v812_v23 = vmul.f32 0.015625, %v766_v22 }
 0x1fc   : > { %v828_v26 = vadd.f32 1e-05, %v812_v23 }
 0x1fd   : > { %v769_v27 = vpop.xlane.xlu1 %768  ;;  %v772_v28 = vpop.xlane.xlu0 %771 }
 0x1fe   : > { %2374 = vrsqrt.f32 %v828_v26  ;;  %v813_v29 = vmul.f32 0.015625, %v769_v27  ;;  %v814_v30 = vmul.f32 0.015625, %v772_v28 }
 0x200   : > { %v829_v32 = vadd.f32 1e-05, %v813_v29  ;;  %v830_v33 = vadd.f32 1e-05, %v814_v30 }
 0x201   : > { %v775_v34 = vpop.xlane.xlu1 %774  ;;  %v778_v36 = vpop.xlane.xlu0 %777 }
 0x202   : > { %2376 = vrsqrt.f32 %v829_v32  ;;  %v815_v38 = vmul.f32 0.015625, %v775_v34  ;;  %v816_v40 = vmul.f32 0.015625, %v778_v36 }
 0x203   : > { %2378 = vrsqrt.f32 %v830_v33 }
 0x204   : > { %v831_v41 = vadd.f32 1e-05, %v815_v38  ;;  %v832_v42 = vadd.f32 1e-05, %v816_v40 }
 0x205   : > { %v781_v45 = vpop.xlane.xlu1 %780  ;;  %v784_v46 = vpop.xlane.xlu0 %783 }
 0x206   : > { %2380 = vrsqrt.f32 %v831_v41  ;;  %v817_v37 = vmul.f32 0.015625, %v781_v45  ;;  %v818_v50 = vmul.f32 0.015625, %v784_v46 }
 0x207   : > { %2382 = vrsqrt.f32 %v832_v42 }
 0x208   : > { %v833_v51 = vadd.f32 1e-05, %v817_v37  ;;  %v834_v52 = vadd.f32 1e-05, %v818_v50 }
 0x209   : > { %v787_v55 = vpop.xlane.xlu1 %786  ;;  %v790_v56 = vpop.xlane.xlu0 %789 }
 0x20a   : > { %2384 = vrsqrt.f32 %v833_v51  ;;  %v819_v58 = vmul.f32 0.015625, %v787_v55  ;;  %v820_v59 = vmul.f32 0.015625, %v790_v56 }
 0x20b   : > { %v2375_v44 = vpop.eup %2374  ;;  %2386 = vrsqrt.f32 %v834_v52 }
 0x20c   : > { %v860_v62 = vmul.f32 %v2375_v44, %v2655_v3  ;;  %v835_v63 = vadd.f32 1e-05, %v819_v58  ;;  %v836_v0 = vadd.f32 1e-05, %v820_v59 }
 0x20d   : > { %v793_v4 = vpop.xlane.xlu1 %792  ;;  %v796_v5 = vpop.xlane.xlu0 %795 }
 0x20e   : > { %2388 = vrsqrt.f32 %v835_v63  ;;  %v821_v48 = vmul.f32 0.015625, %v793_v4  ;;  %v822_v7 = vmul.f32 0.015625, %v796_v5  ;;  %v880_v10 = vmul.f32 %v2760_v61, %v860_v62 }
 0x20f   : > { %v2377_v11 = vpop.eup %2376  ;;  %2390 = vrsqrt.f32 %v836_v0 }
 0x210   : > { %v2379_v12 = vpop.eup %2378  ;;  %v861_v13 = vmul.f32 %v2377_v11, %v2662_v9  ;;  %v837_v3 = vadd.f32 1e-05, %v821_v48  ;;  %v838_v14 = vadd.f32 1e-05, %v822_v7  ;;  %v900_v53 = vadd.f32 %v2766_v1, %v880_v10 }
 0x211   : > { %v862_v16 = vmul.f32 %v2379_v12, %v2652_v2  ;;  %v799_v17 = vpop.xlane.xlu1 %798  ;;  %v802_v18 = vpop.xlane.xlu0 %801 }
 0x212   : > { %2392 = vrsqrt.f32 %v837_v3  ;;  %v823_v19 = vmul.f32 0.015625, %v799_v17  ;;  %v824_v57 = vmul.f32 0.015625, %v802_v18  ;;  %v881_v20 = vmul.f32 %v2760_v61, %v861_v13 }
 0x213   : > { %v2381_v21 = vpop.eup %2380  ;;  %v882_v22 = vmul.f32 %v2760_v61, %v862_v16  ;;  %2394 = vrsqrt.f32 %v838_v14  ;;  %vm916_vm3 = vcmp.gt.f32.partialorder %v900_v53, 0.0  ;;  %v932_v23 = vmul.f32 0.2, %v900_v53 }
 0x214   : > { %v2383_v9 = vpop.eup %2382  ;;  %v863_v26 = vmul.f32 %v2381_v21, %v2660_v8  ;;  %v839_v27 = vadd.f32 1e-05, %v823_v19  ;;  %v840_v28 = vadd.f32 1e-05, %v824_v57  ;;  %v901_v2 = vadd.f32 %v2766_v1, %v881_v20 }
 0x215   : > { %v902_v29 = vadd.f32 %v2766_v1, %v882_v22  ;;  %v864_v30 = vmul.f32 %v2383_v9, %v2669_v15  ;;  %v805_v32 = vpop.xlane.xlu1 %804  ;;  %v808_v33 = vpop.xlane.xlu0 %807  ;;  %v948_v34 = vsel %vm916_vm3, %v900_v53, %v932_v23 }
 0x216   : > { %v883_v36 = vmul.f32 %v2760_v61, %v863_v26  ;;  %2396 = vrsqrt.f32 %v839_v27  ;;  %v825_v38 = vmul.f32 0.015625, %v805_v32  ;;  %v826_v40 = vmul.f32 0.015625, %v808_v33 }
 0x217   : > { %v2385_v41 = vpop.eup %2384  ;;  %2398 = vrsqrt.f32 %v840_v28  ;;  %vm917_vm4 = vcmp.gt.f32.partialorder %v901_v2, 0.0  ;;  %v933_v8 = vmul.f32 0.2, %v901_v2  ;;  %vm918_vm5 = vcmp.gt.f32.partialorder %v902_v29, 0.0 }
 0x218   : > { %v2387_v42 = vpop.eup %2386  ;;  %v903_v45 = vadd.f32 %v2766_v1, %v883_v36  ;;  %v865_v46 = vmul.f32 %v2385_v41, %v2678_v24  ;;  %v841_v37 = vadd.f32 1e-05, %v825_v38  ;;  %v842_v15 = vadd.f32 1e-05, %v826_v40 }
 0x219   : > { %v866_v50 = vmul.f32 %v2387_v42, %v2681_v25  ;;  %v811_v51 = vpop.xlane.xlu1 %810  ;;  %v949_v52 = vsel %vm917_vm4, %v901_v2, %v933_v8  ;;  %v934_v55 = vmul.f32 0.2, %v902_v29  ;;  %v884_v56 = vmul.f32 %v2760_v61, %v864_v30 }
 0x21a   : > { %2400 = vrsqrt.f32 %v841_v37  ;;  %v827_v58 = vmul.f32 0.015625, %v811_v51  ;;  %v964_v59 = vpack.c.bf16 %v949_v52, %v948_v34  ;;  %vm919_vm6 = vcmp.gt.f32.partialorder %v903_v45, 0.0 }
 0x21b   : > { %v2389_v44 = vpop.eup %2388  ;;  %2402 = vrsqrt.f32 %v842_v15  ;;  %v935_v62 = vmul.f32 0.2, %v903_v45  ;;  %v885_v63 = vmul.f32 %v2760_v61, %v865_v46  ;;  %v904_v25 = vadd.f32 %v2766_v1, %v884_v56 }
 0x21c   : > { %v2391_v0 = vpop.eup %2390  ;;  %v867_v24 = vmul.f32 %v2389_v44, %v2690_v35  ;;  %v843_v4 = vadd.f32 1e-05, %v827_v58  ;;  %2272 = vmatprep.mubr.msk.bf16.mxu1 %vm666_vm2, %v964_v59  ;;  %v886_v5 = vmul.f32 %v2760_v61, %v866_v50  ;;  %v950_v7 = vsel %vm918_vm5, %v902_v29, %v934_v55 }
 0x21d   : > { %v868_v48 = vmul.f32 %v2391_v0, %v2693_v31  ;;  %v951_v10 = vsel %vm919_vm6, %v903_v45, %v935_v62  ;;  %v905_v11 = vadd.f32 %v2766_v1, %v885_v63  ;;  %vm920_vm7 = vcmp.gt.f32.partialorder %v904_v25, 0.0 }
 0x21e   : > { %2404 = vrsqrt.f32 %v843_v4  ;;  %v965_v12 = vpack.c.bf16 %v951_v10, %v950_v7  ;;  %v936_v13 = vmul.f32 0.2, %v904_v25  ;;  %v887_v14 = vmul.f32 %v2760_v61, %v867_v24 }
 0x21f   : > { %v2393_v3 = vpop.eup %2392  ;;  %vm921_vm8 = vcmp.gt.f32.partialorder %v905_v11, 0.0  ;;  %v937_v35 = vmul.f32 0.2, %v905_v11  ;;  %v906_v53 = vadd.f32 %v2766_v1, %v886_v5  ;;  %v888_v18 = vmul.f32 %v2760_v61, %v868_v48 }
 0x220   : > { %v2395_v16 = vpop.eup %2394  ;;  %v869_v17 = vmul.f32 %v2393_v3, %v2702_v47  ;;  %2273 = vmatmul.mubr.msk.bf16.vlgmr.msra.gmra.mxu1 %vm666_vm2, %v965_v12  ;;  %v952_v31 = vsel %vm920_vm7, %v904_v25, %v936_v13  ;;  %v907_v20 = vadd.f32 %v2766_v1, %v887_v14 }
 0x221   : > { %v870_v19 = vmul.f32 %v2395_v16, %v2705_v39  ;;  %v953_v57 = vsel %vm921_vm8, %v905_v11, %v937_v35  ;;  %vm922_vm9 = vcmp.gt.f32.partialorder %v906_v53, 0.0  ;;  %v938_v22 = vmul.f32 0.2, %v906_v53 }
 0x222   : > { %v966_v21 = vpack.c.bf16 %v953_v57, %v952_v31  ;;  %v889_v23 = vmul.f32 %v2760_v61, %v869_v17  ;;  %v908_v9 = vadd.f32 %v2766_v1, %v888_v18  ;;  %vm923_vm10 = vcmp.gt.f32.partialorder %v907_v20, 0.0 }
 0x223   : > { %v2397_v26 = vpop.eup %2396  ;;  %v939_v47 = vmul.f32 0.2, %v907_v20  ;;  %v890_v27 = vmul.f32 %v2760_v61, %v870_v19  ;;  %v954_v39 = vsel %vm922_vm9, %v906_v53, %v938_v22 }
 0x224   : > { %v2399_v28 = vpop.eup %2398  ;;  %v871_v2 = vmul.f32 %v2397_v26, %v2714_v60  ;;  %2276 = vmatprep.mubr.msk.bf16.mxu1 %vm666_vm2, %v966_v21  ;;  %v909_v29 = vadd.f32 %v2766_v1, %v889_v23  ;;  %vm924_vm11 = vcmp.gt.f32.partialorder %v908_v9, 0.0  ;;  %v940_v33 = vmul.f32 0.2, %v908_v9 }
 0x225   : > { %v872_v30 = vmul.f32 %v2399_v28, %v2717_v43  ;;  %v955_v32 = vsel %vm923_vm10, %v907_v20, %v939_v47  ;;  %v910_v34 = vadd.f32 %v2766_v1, %v890_v27 }
 0x226   : > { %v967_v36 = vpack.c.bf16 %v955_v32, %v954_v39  ;;  %vm925_vm12 = vcmp.gt.f32.partialorder %v909_v29, 0.0  ;;  %v941_v38 = vmul.f32 0.2, %v909_v29  ;;  %v891_v40 = vmul.f32 %v2760_v61, %v871_v2 }
 0x227   : > { %v2401_v41 = vpop.eup %2400  ;;  %v956_v8 = vsel %vm924_vm11, %v908_v9, %v940_v33  ;;  %v942_v60 = vmul.f32 0.2, %v910_v34  ;;  %v892_v42 = vmul.f32 %v2760_v61, %v872_v30  ;;  %vm926_vm13 = vcmp.gt.f32.partialorder %v910_v34, 0.0 }
 0x228   : > { %v2403_v45 = vpop.eup %2402  ;;  %v873_v46 = vmul.f32 %v2401_v41, %v2726_v6  ;;  %2277 = vmatmul.mubr.msk.bf16.gmra.mxu1 %vm666_vm2, %v967_v36  ;;  %v957_v43 = vsel %vm925_vm12, %v909_v29, %v941_v38  ;;  %v911_v37 = vadd.f32 %v2766_v1, %v891_v40 }
 0x229   : > { %v874_v15 = vmul.f32 %v2403_v45, %v2729_v49  ;;  %v968_v50 = vpack.c.bf16 %v957_v43, %v956_v8  ;;  %v912_v51 = vadd.f32 %v2766_v1, %v892_v42  ;;  %v958_v58 = vsel %vm926_vm13, %v910_v34, %v942_v60 }
 0x22a   : > { %vm927_vm14 = vcmp.gt.f32.partialorder %v911_v37, 0.0  ;;  %v943_v52 = vmul.f32 0.2, %v911_v37  ;;  %v893_v55 = vmul.f32 %v2760_v61, %v873_v46 }
 0x22b   : > { %v2405_v56 = vpop.eup %2404  ;;  %2280 = vmatprep.mubr.msk.bf16.mxu1 %vm666_vm2, %v968_v50  ;;  %v894_v6 = vmul.f32 %v2760_v61, %v874_v15  ;;  %v944_v63 = vmul.f32 0.2, %v912_v51  ;;  %vm928_vm15 = vcmp.gt.f32.partialorder %v912_v51, 0.0 }
 0x22c   : > { %v875_v59 = vmul.f32 %v2405_v56, %v2738_v54  ;;  %v959_v44 = vsel %vm927_vm14, %v911_v37, %v943_v52  ;;  %v913_v62 = vadd.f32 %v2766_v1, %v893_v55 }
 0x22d   : > { %v969_v49 = vpack.c.bf16 %v959_v44, %v958_v58  ;;  %v914_v0 = vadd.f32 %v2766_v1, %v894_v6  ;;  %v960_v25 = vsel %vm928_vm15, %v912_v51, %v944_v63 }
 0x22e   : > { %vm929_vm0 = vcmp.gt.f32.partialorder %v913_v62, 0.0  ;;  %v945_v24 = vmul.f32 0.2, %v913_v62  ;;  %v895_v4 = vmul.f32 %v2760_v61, %v875_v59  ;;  %v2173_v61 = vld [vmem:[%s3425_s3 + $0x2] ss:$0 sm:$0xff] }
 0x22f   : > { %v946_v7 = vmul.f32 0.2, %v914_v0  ;;  %vm930_vm1 = vcmp.gt.f32.partialorder %v914_v0, 0.0 }
 0x230   : > { %2281 = vmatmul.mubr.msk.bf16.gmra.mxu1 %vm666_vm2, %v969_v49  ;;  %v961_v5 = vsel %vm929_vm0, %v913_v62, %v945_v24  ;;  %v915_v48 = vadd.f32 %v2766_v1, %v895_v4 }
 0x231   : > { %v970_v54 = vpack.c.bf16 %v961_v5, %v960_v25  ;;  %v962_v11 = vsel %vm930_vm1, %v914_v0, %v946_v7 }
 0x232   : > { %vm931_vm3 = vcmp.gt.f32.partialorder %v915_v48, 0.0  ;;  %v947_v10 = vmul.f32 0.2, %v915_v48 }
 0x233   : > { %2284 = vmatprep.mubr.msk.bf16.mxu1 %vm666_vm2, %v970_v54 }
 0x234   : > { %v963_v12 = vsel %vm931_vm3, %v915_v48, %v947_v10 }
 0x235   : > { %v971_v13 = vpack.c.bf16 %v963_v12, %v962_v11 }
 0x238   : > { %2285 = vmatmul.mubr.msk.bf16.gmra.mxu1 %vm666_vm2, %v971_v13 }
 0x2e0   : > { %v2274_v3 = vpop.f32.mrf.mxu1 }
 0x2e1   : > { %v2829_v53 = vadd.f32 %v2274_v3, %v2173_v61 }
 0x2e2   : > { %v1067_v35 = vpop.f32.mrf.mxu1 }
 0x2e3   : > { %v2827_v14 = vadd.f32 %v2173_v61, %v1067_v35  ;;  %v1138_v20 = vsel %vm666_vm2, %v2829_v53, 0.0 }
 0x2e4   : > { %v2275_v1 = vpop.f32.mrf.mxu1 }
 0x2e5   : > { %v1132_v16 = vsel %vm666_vm2, %v2827_v14, 0.0  ;;  %v2835_v19 = vadd.f32 %v2275_v1, %v2173_v61 }
 0x2e6   : > { %v1070_v17 = vpop.f32.mrf.mxu1  ;;  %1133 = vadd.xlane.f32.xlu0 %v1132_v16 }
 0x2e7   : > { %v2833_v31 = vadd.f32 %v2173_v61, %v1070_v17  ;;  %v1141_v26 = vsel %vm666_vm2, %v2835_v19, 0.0 }
 0x2e8   : > { %v2278_v18 = vpop.f32.mrf.mxu1 }
 0x2e9   : > { %v1135_v57 = vsel %vm666_vm2, %v2833_v31, 0.0  ;;  %v2843_v9 = vadd.f32 %v2278_v18, %v2173_v61 }
 0x2ea   : > { %1136 = vadd.xlane.f32.xlu1 %v1135_v57  ;;  %1139 = vadd.xlane.f32.xlu0 %v1138_v20  ;;  %v1083_v21 = vpop.f32.mrf.mxu1 }
 0x2eb   : > { %v2841_v22 = vadd.f32 %v2173_v61, %v1083_v21  ;;  %v1150_v30 = vsel %vm666_vm2, %v2843_v9, 0.0 }
 0x2ec   : > { %v2279_v23 = vpop.f32.mrf.mxu1 }
 0x2ed   : > { %v1144_v47 = vsel %vm666_vm2, %v2841_v22, 0.0  ;;  %v2851_v39 = vadd.f32 %v2279_v23, %v2173_v61 }
 0x2ee   : > { %1142 = vadd.xlane.f32.xlu1 %v1141_v26  ;;  %v1086_v27 = vpop.f32.mrf.mxu1  ;;  %1145 = vadd.xlane.f32.xlu0 %v1144_v47 }
 0x2ef   : > { %v2849_v28 = vadd.f32 %v2173_v61, %v1086_v27  ;;  %v1153_v38 = vsel %vm666_vm2, %v2851_v39, 0.0 }
 0x2f0   : > { %v2282_v2 = vpop.f32.mrf.mxu1 }
 0x2f1   : > { %v1147_v29 = vsel %vm666_vm2, %v2849_v28, 0.0  ;;  %v2859_v36 = vadd.f32 %v2282_v2, %v2173_v61 }
 0x2f2   : > { %1148 = vadd.xlane.f32.xlu1 %v1147_v29  ;;  %1151 = vadd.xlane.f32.xlu0 %v1150_v30  ;;  %v1099_v32 = vpop.f32.mrf.mxu1 }
 0x2f3   : > { %v2857_v33 = vadd.f32 %v2173_v61, %v1099_v32  ;;  %v1162_v46 = vsel %vm666_vm2, %v2859_v36, 0.0 }
 0x2f4   : > { %v2283_v34 = vpop.f32.mrf.mxu1 }
 0x2f5   : > { %v1156_v40 = vsel %vm666_vm2, %v2857_v33, 0.0  ;;  %v2867_v42 = vadd.f32 %v2283_v34, %v2173_v61 }
 0x2f6   : > { %1154 = vadd.xlane.f32.xlu1 %v1153_v38  ;;  %v1102_v41 = vpop.f32.mrf.mxu1  ;;  %1157 = vadd.xlane.f32.xlu0 %v1156_v40 }
 0x2f7   : > { %v2865_v8 = vadd.f32 %v2173_v61, %v1102_v41  ;;  %v1165_v51 = vsel %vm666_vm2, %v2867_v42, 0.0 }
 0x2f8   : > { %v2286_v60 = vpop.f32.mrf.mxu1 }
 0x2f9   : > { %v1159_v45 = vsel %vm666_vm2, %v2865_v8, 0.0  ;;  %v2875_v50 = vadd.f32 %v2286_v60, %v2173_v61 }
 0x2fa   : > { %1160 = vadd.xlane.f32.xlu1 %v1159_v45  ;;  %1163 = vadd.xlane.f32.xlu0 %v1162_v46  ;;  %v1115_v43 = vpop.f32.mrf.mxu1 }
 0x2fb   : > { %v2873_v37 = vadd.f32 %v2173_v61, %v1115_v43  ;;  %v1174_v59 = vsel %vm666_vm2, %v2875_v50, 0.0 }
 0x2fc   : > { %v2287_v15 = vpop.f32.mrf.mxu1 }
 0x2fd   : > { %v1168_v52 = vsel %vm666_vm2, %v2873_v37, 0.0  ;;  %v2883_v58 = vadd.f32 %v2287_v15, %v2173_v61 }
 0x2fe   : > { %1166 = vadd.xlane.f32.xlu1 %v1165_v51  ;;  %v1118_v55 = vpop.f32.mrf.mxu1  ;;  %1169 = vadd.xlane.f32.xlu0 %v1168_v52 }
 0x2ff   : > { %v2881_v56 = vadd.f32 %v2173_v61, %v1118_v55  ;;  %v1177_v44 = vsel %vm666_vm2, %v2883_v58, 0.0 }
 0x301   : > { %v1171_v6 = vsel %vm666_vm2, %v2881_v56, 0.0 }
 0x302   : > { %1172 = vadd.xlane.f32.xlu1 %v1171_v6  ;;  %1175 = vadd.xlane.f32.xlu0 %v1174_v59 }
 0x306   : > { %1178 = vadd.xlane.f32.xlu1 %v1177_v44 }
 0x36f   : > { %v1134_v62 = vpop.xlane.xlu0 %1133 }
 0x370   : > { %v1180_v63 = vmul.f32 0.015625, %v1134_v62 }
 0x372   : > { %v2892_v49 = vsub.f32 %v2827_v14, %v1180_v63 }
 0x373   : > { %v1137_v0 = vpop.xlane.xlu1 %1136  ;;  %v1140_v24 = vpop.xlane.xlu0 %1139 }
 0x374   : > { %v1181_v4 = vmul.f32 0.015625, %v1137_v0  ;;  %v1182_v25 = vmul.f32 0.015625, %v1140_v24  ;;  %v1212_v5 = vmul.f32 %v2892_v49, %v2892_v49 }
 0x376   : > { %v2897_v48 = vsub.f32 %v2833_v31, %v1181_v4  ;;  %v2900_v7 = vsub.f32 %v2829_v53, %v1182_v25  ;;  %v1228_v54 = vsel %vm666_vm2, %v1212_v5, 0.0 }
 0x377   : > { %v1143_v10 = vpop.xlane.xlu1 %1142  ;;  %1229 = vadd.xlane.f32.xlu0 %v1228_v54  ;;  %v1146_v11 = vpop.xlane.xlu0 %1145 }
 0x378   : > { %v1183_v12 = vmul.f32 0.015625, %v1143_v10  ;;  %v1184_v13 = vmul.f32 0.015625, %v1146_v11  ;;  %v1213_v3 = vmul.f32 %v2897_v48, %v2897_v48  ;;  %v1214_v61 = vmul.f32 %v2900_v7, %v2900_v7 }
 0x37a   : > { %v2908_v35 = vsub.f32 %v2835_v19, %v1183_v12  ;;  %v2911_v14 = vsub.f32 %v2841_v22, %v1184_v13  ;;  %v1231_v1 = vsel %vm666_vm2, %v1213_v3, 0.0  ;;  %v1234_v53 = vsel %vm666_vm2, %v1214_v61, 0.0 }
 0x37b   : > { %v1149_v16 = vpop.xlane.xlu1 %1148  ;;  %1232 = vadd.xlane.f32.xlu1 %v1231_v1  ;;  %1235 = vadd.xlane.f32.xlu0 %v1234_v53  ;;  %v1152_v17 = vpop.xlane.xlu0 %1151 }
 0x37c   : > { %v1185_v31 = vmul.f32 0.015625, %v1149_v16  ;;  %v1186_v18 = vmul.f32 0.015625, %v1152_v17  ;;  %v1215_v57 = vmul.f32 %v2908_v35, %v2908_v35  ;;  %v1216_v19 = vmul.f32 %v2911_v14, %v2911_v14  ;;  %v2362_v17 = vld [vmem:[%s3427_s5 + $0x18] sm:$0xff]  }
 0x37d   : > { %2288 = vmatprep.subr.bf16.mxu0 %v2362_v17 }
 0x37e   : > { %v2920_v20 = vsub.f32 %v2849_v28, %v1185_v31  ;;  %v2923_v21 = vsub.f32 %v2843_v9, %v1186_v18  ;;  %v1237_v22 = vsel %vm666_vm2, %v1215_v57, 0.0  ;;  %v1240_v23 = vsel %vm666_vm2, %v1216_v19, 0.0  ;;  %2289 = vmatpush3.bf16.msra.mxu0 %v2362_v17  ;;  %v2364_v31 = vld [vmem:[%s3427_s5 + $0x8] sm:$0xff]   ;;  %v2365_v18 = vld [vmem:[%s3427_s5] sm:$0xff]  }
 0x37f   : > { %v1155_v26 = vpop.xlane.xlu1 %1154  ;;  %1238 = vadd.xlane.f32.xlu1 %v1237_v22  ;;  %1241 = vadd.xlane.f32.xlu0 %v1240_v23  ;;  %v1158_v47 = vpop.xlane.xlu0 %1157 }
 0x380   : > { %v1187_v27 = vmul.f32 0.015625, %v1155_v26  ;;  %v1188_v2 = vmul.f32 0.015625, %v1158_v47  ;;  %v1217_v29 = vmul.f32 %v2920_v20, %v2920_v20  ;;  %v1218_v28 = vmul.f32 %v2923_v21, %v2923_v21 }
 0x382   : > { %v2932_v30 = vsub.f32 %v2851_v39, %v1187_v27  ;;  %v2935_v9 = vsub.f32 %v2857_v33, %v1188_v2  ;;  %v1243_v32 = vsel %vm666_vm2, %v1217_v29, 0.0  ;;  %v1246_v34 = vsel %vm666_vm2, %v1218_v28, 0.0 }
 0x383   : > { %v1161_v38 = vpop.xlane.xlu1 %1160  ;;  %1244 = vadd.xlane.f32.xlu1 %v1243_v32  ;;  %1247 = vadd.xlane.f32.xlu0 %v1246_v34  ;;  %v1164_v40 = vpop.xlane.xlu0 %1163 }
 0x384   : > { %v1189_v41 = vmul.f32 0.015625, %v1161_v38  ;;  %v1190_v60 = vmul.f32 0.015625, %v1164_v40  ;;  %v1219_v45 = vmul.f32 %v2932_v30, %v2932_v30  ;;  %v1220_v39 = vmul.f32 %v2935_v9, %v2935_v9 }
 0x386   : > { %v2944_v46 = vsub.f32 %v2865_v8, %v1189_v41  ;;  %v2947_v33 = vsub.f32 %v2859_v36, %v1190_v60  ;;  %v1249_v43 = vsel %vm666_vm2, %v1219_v45, 0.0  ;;  %v1252_v15 = vsel %vm666_vm2, %v1220_v39, 0.0 }
 0x387   : > { %v1167_v51 = vpop.xlane.xlu1 %1166  ;;  %1250 = vadd.xlane.f32.xlu1 %v1249_v43  ;;  %1253 = vadd.xlane.f32.xlu0 %v1252_v15  ;;  %v1170_v52 = vpop.xlane.xlu0 %1169 }
 0x388   : > { %v1191_v55 = vmul.f32 0.015625, %v1167_v51  ;;  %v1192_v6 = vmul.f32 0.015625, %v1170_v52  ;;  %v1221_v59 = vmul.f32 %v2944_v46, %v2944_v46  ;;  %v1222_v8 = vmul.f32 %v2947_v33, %v2947_v33 }
 0x38a   : > { %v2956_v44 = vsub.f32 %v2867_v42, %v1191_v55  ;;  %v2959_v36 = vsub.f32 %v2873_v37, %v1192_v6  ;;  %v1255_v62 = vsel %vm666_vm2, %v1221_v59, 0.0  ;;  %v1258_v63 = vsel %vm666_vm2, %v1222_v8, 0.0 }
 0x38b   : > { %1256 = vadd.xlane.f32.xlu1 %v1255_v62  ;;  %v1173_v0 = vpop.xlane.xlu1 %1172  ;;  %1259 = vadd.xlane.f32.xlu0 %v1258_v63  ;;  %v1176_v24 = vpop.xlane.xlu0 %1175  ;;  %v3002_v62 = vld [vmem:[%s3425_s3 + $0x3] ss:$0 sm:$0xff] }
 0x38c   : > { %v1193_v4 = vmul.f32 0.015625, %v1173_v0  ;;  %v1194_v25 = vmul.f32 0.015625, %v1176_v24  ;;  %v1223_v5 = vmul.f32 %v2956_v44, %v2956_v44  ;;  %v1224_v42 = vmul.f32 %v2959_v36, %v2959_v36 }
 0x38e   : > { %v2968_v54 = vsub.f32 %v2881_v56, %v1193_v4  ;;  %v2971_v37 = vsub.f32 %v2875_v50, %v1194_v25  ;;  %v1261_v10 = vsel %vm666_vm2, %v1223_v5, 0.0  ;;  %v1264_v11 = vsel %vm666_vm2, %v1224_v42, 0.0  ;;  %v3008_v4 = vld [vmem:[%s3425_s3 + $0x4] ss:$0 sm:$0xff] }
 0x38f   : > { %1262 = vadd.xlane.f32.xlu1 %v1261_v10  ;;  %v1179_v12 = vpop.xlane.xlu1 %1178  ;;  %1265 = vadd.xlane.f32.xlu0 %v1264_v11 }
 0x390   : > { %v1195_v13 = vmul.f32 0.015625, %v1179_v12  ;;  %v1225_v3 = vmul.f32 %v2968_v54, %v2968_v54  ;;  %v1226_v61 = vmul.f32 %v2971_v37, %v2971_v37 }
 0x392   : > { %v2980_v56 = vsub.f32 %v2883_v58, %v1195_v13  ;;  %v1267_v50 = vsel %vm666_vm2, %v1225_v3, 0.0  ;;  %v1270_v1 = vsel %vm666_vm2, %v1226_v61, 0.0  ;;  %v2363_v58 = vld [vmem:[%s3427_s5 + $0x10] sm:$0xff]  }
 0x393   : > { %1268 = vadd.xlane.f32.xlu1 %v1267_v50  ;;  %1271 = vadd.xlane.f32.xlu0 %v1270_v1 }
 0x394   : > { %v1227_v53 = vmul.f32 %v2980_v56, %v2980_v56  ;;  %2290 = vmatprep.subr.bf16.mxu0 %v2363_v58 }
 0x395   : > { %2291 = vmatpush3.bf16.msra.mxu0 %v2363_v58 }
 0x396   : > { %v1273_v16 = vsel %vm666_vm2, %v1227_v53, 0.0  ;;  %2292 = vmatprep.subr.bf16.mxu0 %v2364_v31 }
 0x397   : > { %1274 = vadd.xlane.f32.xlu1 %v1273_v16 }
 0x399   : > { %2293 = vmatpush3.bf16.msra.mxu0 %v2364_v31 }
 0x39a   : > { %2294 = vmatprep.subr.bf16.mxu0 %v2365_v18 }
 0x39d   : > { %2295 = vmatpush3.bf16.msra.mxu0 %v2365_v18 }
 0x400   : > { %v1230_v57 = vpop.xlane.xlu0 %1229 }
 0x401   : > { %v1276_v19 = vmul.f32 0.015625, %v1230_v57 }
 0x403   : > { %v1292_v22 = vadd.f32 1e-05, %v1276_v19 }
 0x404   : > { %v1233_v23 = vpop.xlane.xlu1 %1232  ;;  %v1236_v26 = vpop.xlane.xlu0 %1235 }
 0x405   : > { %2406 = vrsqrt.f32 %v1292_v22  ;;  %v1277_v47 = vmul.f32 0.015625, %v1233_v23  ;;  %v1278_v27 = vmul.f32 0.015625, %v1236_v26 }
 0x407   : > { %v1293_v2 = vadd.f32 1e-05, %v1277_v47  ;;  %v1294_v29 = vadd.f32 1e-05, %v1278_v27 }
 0x408   : > { %v1239_v28 = vpop.xlane.xlu1 %1238  ;;  %v1242_v32 = vpop.xlane.xlu0 %1241 }
 0x409   : > { %2408 = vrsqrt.f32 %v1293_v2  ;;  %v1279_v34 = vmul.f32 0.015625, %v1239_v28  ;;  %v1280_v38 = vmul.f32 0.015625, %v1242_v32 }
 0x40a   : > { %2410 = vrsqrt.f32 %v1294_v29 }
 0x40b   : > { %v1295_v40 = vadd.f32 1e-05, %v1279_v34  ;;  %v1296_v41 = vadd.f32 1e-05, %v1280_v38 }
 0x40c   : > { %v1245_v60 = vpop.xlane.xlu1 %1244  ;;  %v1248_v45 = vpop.xlane.xlu0 %1247 }
 0x40d   : > { %2412 = vrsqrt.f32 %v1295_v40  ;;  %v1281_v39 = vmul.f32 0.015625, %v1245_v60  ;;  %v1282_v43 = vmul.f32 0.015625, %v1248_v45 }
 0x40e   : > { %2414 = vrsqrt.f32 %v1296_v41 }
 0x40f   : > { %v1297_v15 = vadd.f32 1e-05, %v1281_v39  ;;  %v1298_v51 = vadd.f32 1e-05, %v1282_v43 }
 0x410   : > { %v1251_v52 = vpop.xlane.xlu1 %1250  ;;  %v1254_v55 = vpop.xlane.xlu0 %1253 }
 0x411   : > { %2416 = vrsqrt.f32 %v1297_v15  ;;  %v1283_v6 = vmul.f32 0.015625, %v1251_v52  ;;  %v1284_v59 = vmul.f32 0.015625, %v1254_v55 }
 0x412   : > { %v2407_v8 = vpop.eup %2406  ;;  %2418 = vrsqrt.f32 %v1298_v51 }
 0x413   : > { %v1324_v63 = vmul.f32 %v2407_v8, %v2892_v49  ;;  %v1299_v0 = vadd.f32 1e-05, %v1283_v6  ;;  %v1300_v24 = vadd.f32 1e-05, %v1284_v59 }
 0x414   : > { %v1257_v25 = vpop.xlane.xlu1 %1256  ;;  %v1260_v5 = vpop.xlane.xlu0 %1259 }
 0x415   : > { %2420 = vrsqrt.f32 %v1299_v0  ;;  %v1285_v42 = vmul.f32 0.015625, %v1257_v25  ;;  %v1286_v10 = vmul.f32 0.015625, %v1260_v5  ;;  %v1344_v11 = vmul.f32 %v3002_v62, %v1324_v63 }
 0x416   : > { %v2409_v12 = vpop.eup %2408  ;;  %2422 = vrsqrt.f32 %v1300_v24 }
 0x417   : > { %v2411_v13 = vpop.eup %2410  ;;  %v1325_v3 = vmul.f32 %v2409_v12, %v2897_v48  ;;  %v1301_v49 = vadd.f32 1e-05, %v1285_v42  ;;  %v1302_v61 = vadd.f32 1e-05, %v1286_v10  ;;  %v1364_v50 = vadd.f32 %v3008_v4, %v1344_v11 }
 0x418   : > { %v1326_v1 = vmul.f32 %v2411_v13, %v2900_v7  ;;  %v1263_v53 = vpop.xlane.xlu1 %1262  ;;  %v1266_v16 = vpop.xlane.xlu0 %1265 }
 0x419   : > { %2424 = vrsqrt.f32 %v1301_v49  ;;  %v1287_v17 = vmul.f32 0.015625, %v1263_v53  ;;  %v1288_v58 = vmul.f32 0.015625, %v1266_v16  ;;  %v1345_v31 = vmul.f32 %v3002_v62, %v1325_v3 }
 0x41a   : > { %v2413_v18 = vpop.eup %2412  ;;  %v1346_v57 = vmul.f32 %v3002_v62, %v1326_v1  ;;  %2426 = vrsqrt.f32 %v1302_v61  ;;  %vm1380_vm4 = vcmp.gt.f32.partialorder %v1364_v50, 0.0  ;;  %v1396_v19 = vmul.f32 0.2, %v1364_v50 }
 0x41b   : > { %v2415_v48 = vpop.eup %2414  ;;  %v1327_v22 = vmul.f32 %v2413_v18, %v2908_v35  ;;  %v1303_v23 = vadd.f32 1e-05, %v1287_v17  ;;  %v1304_v26 = vadd.f32 1e-05, %v1288_v58  ;;  %v1365_v7 = vadd.f32 %v3008_v4, %v1345_v31 }
 0x41c   : > { %v1366_v47 = vadd.f32 %v3008_v4, %v1346_v57  ;;  %v1328_v27 = vmul.f32 %v2415_v48, %v2911_v14  ;;  %v1269_v2 = vpop.xlane.xlu1 %1268  ;;  %v1272_v29 = vpop.xlane.xlu0 %1271  ;;  %v1412_v28 = vsel %vm1380_vm4, %v1364_v50, %v1396_v19 }
 0x41d   : > { %v1347_v32 = vmul.f32 %v3002_v62, %v1327_v22  ;;  %2428 = vrsqrt.f32 %v1303_v23  ;;  %v1289_v34 = vmul.f32 0.015625, %v1269_v2  ;;  %v1290_v38 = vmul.f32 0.015625, %v1272_v29 }
 0x41e   : > { %v2417_v40 = vpop.eup %2416  ;;  %2430 = vrsqrt.f32 %v1304_v26  ;;  %vm1381_vm5 = vcmp.gt.f32.partialorder %v1365_v7, 0.0  ;;  %v1397_v35 = vmul.f32 0.2, %v1365_v7  ;;  %vm1382_vm6 = vcmp.gt.f32.partialorder %v1366_v47, 0.0 }
 0x41f   : > { %v2419_v41 = vpop.eup %2418  ;;  %v1367_v60 = vadd.f32 %v3008_v4, %v1347_v32  ;;  %v1329_v45 = vmul.f32 %v2417_v40, %v2920_v20  ;;  %v1305_v39 = vadd.f32 1e-05, %v1289_v34  ;;  %v1306_v14 = vadd.f32 1e-05, %v1290_v38 }
 0x420   : > { %v1330_v43 = vmul.f32 %v2419_v41, %v2923_v21  ;;  %v1275_v15 = vpop.xlane.xlu1 %1274  ;;  %v1413_v51 = vsel %vm1381_vm5, %v1365_v7, %v1397_v35  ;;  %v1398_v52 = vmul.f32 0.2, %v1366_v47  ;;  %v1348_v55 = vmul.f32 %v3002_v62, %v1328_v27 }
 0x421   : > { %2432 = vrsqrt.f32 %v1305_v39  ;;  %v1291_v6 = vmul.f32 0.015625, %v1275_v15  ;;  %v1428_v59 = vpack.c.bf16 %v1413_v51, %v1412_v28  ;;  %vm1383_vm7 = vcmp.gt.f32.partialorder %v1367_v60, 0.0 }
 0x422   : > { %v2421_v8 = vpop.eup %2420  ;;  %2434 = vrsqrt.f32 %v1306_v14  ;;  %v1399_v63 = vmul.f32 0.2, %v1367_v60  ;;  %v1349_v0 = vmul.f32 %v3002_v62, %v1329_v45  ;;  %v1368_v21 = vadd.f32 %v3008_v4, %v1348_v55 }
 0x423   : > { %v2423_v24 = vpop.eup %2422  ;;  %v1331_v20 = vmul.f32 %v2421_v8, %v2932_v30  ;;  %v1307_v25 = vadd.f32 1e-05, %v1291_v6  ;;  %2296 = vmatprep.mubr.msk.bf16.mxu0 %vm666_vm2, %v1428_v59  ;;  %v1350_v5 = vmul.f32 %v3002_v62, %v1330_v43  ;;  %v1414_v10 = vsel %vm1382_vm6, %v1366_v47, %v1398_v52 }
 0x424   : > { %v1332_v42 = vmul.f32 %v2423_v24, %v2935_v9  ;;  %v1415_v11 = vsel %vm1383_vm7, %v1367_v60, %v1399_v63  ;;  %v1369_v12 = vadd.f32 %v3008_v4, %v1349_v0  ;;  %vm1384_vm8 = vcmp.gt.f32.partialorder %v1368_v21, 0.0 }
 0x425   : > { %2436 = vrsqrt.f32 %v1307_v25  ;;  %v1429_v13 = vpack.c.bf16 %v1415_v11, %v1414_v10  ;;  %v1400_v3 = vmul.f32 0.2, %v1368_v21  ;;  %v1351_v61 = vmul.f32 %v3002_v62, %v1331_v20 }
 0x426   : > { %v2425_v49 = vpop.eup %2424  ;;  %vm1385_vm9 = vcmp.gt.f32.partialorder %v1369_v12, 0.0  ;;  %v1401_v30 = vmul.f32 0.2, %v1369_v12  ;;  %v1370_v50 = vadd.f32 %v3008_v4, %v1350_v5  ;;  %v1352_v16 = vmul.f32 %v3002_v62, %v1332_v42 }
 0x427   : > { %v2427_v1 = vpop.eup %2426  ;;  %v1333_v53 = vmul.f32 %v2425_v49, %v2944_v46  ;;  %2297 = vmatmul.mubr.msk.bf16.vlgmr.msra.gmra.mxu0 %vm666_vm2, %v1429_v13  ;;  %v1416_v9 = vsel %vm1384_vm8, %v1368_v21, %v1400_v3  ;;  %v1371_v31 = vadd.f32 %v3008_v4, %v1351_v61  ;;  %vm1886_vm5 = vcmask 195584  }
 0x428   : > { %v1334_v17 = vmul.f32 %v2427_v1, %v2947_v33  ;;  %v1417_v58 = vsel %vm1385_vm9, %v1369_v12, %v1401_v30  ;;  %vm1386_vm10 = vcmp.gt.f32.partialorder %v1370_v50, 0.0  ;;  %v1402_v57 = vmul.f32 0.2, %v1370_v50 }
 0x429   : > { %v1430_v18 = vpack.c.bf16 %v1417_v58, %v1416_v9  ;;  %v1353_v19 = vmul.f32 %v3002_v62, %v1333_v53  ;;  %v1372_v48 = vadd.f32 %v3008_v4, %v1352_v16  ;;  %vm1387_vm11 = vcmp.gt.f32.partialorder %v1371_v31, 0.0 }
 0x42a   : > { %v2429_v22 = vpop.eup %2428  ;;  %v1403_v46 = vmul.f32 0.2, %v1371_v31  ;;  %v1354_v23 = vmul.f32 %v3002_v62, %v1334_v17  ;;  %v1418_v33 = vsel %vm1386_vm10, %v1370_v50, %v1402_v57  ;;  %v3090_v17 = vld [vmem:[%s3422_s0] sm:$0xff]   ;;  %vm1805_vm6 = vcmask 31744  }
 0x42b   : > { %v2431_v26 = vpop.eup %2430  ;;  %v1335_v7 = vmul.f32 %v2429_v22, %v2956_v44  ;;  %2300 = vmatprep.mubr.msk.bf16.mxu0 %vm666_vm2, %v1430_v18  ;;  %v1373_v47 = vadd.f32 %v3008_v4, %v1353_v19  ;;  %vm1388_vm12 = vcmp.gt.f32.partialorder %v1372_v48, 0.0  ;;  %v1404_v29 = vmul.f32 0.2, %v1372_v48 }
 0x42c   : > { %v1336_v27 = vmul.f32 %v2431_v26, %v2959_v36  ;;  %v1419_v2 = vsel %vm1387_vm11, %v1371_v31, %v1403_v46  ;;  %v1374_v28 = vadd.f32 %v3008_v4, %v1354_v23  ;;  %v1596_v58 = vunpack.c.l.bf16 %v3090_v17 }
 0x42d   : > { %v1431_v32 = vpack.c.bf16 %v1419_v2, %v1418_v33  ;;  %vm1389_vm13 = vcmp.gt.f32.partialorder %v1373_v47, 0.0  ;;  %v1405_v34 = vmul.f32 0.2, %v1373_v47  ;;  %v1355_v38 = vmul.f32 %v3002_v62, %v1335_v7 }
 0x42e   : > { %v2433_v40 = vpop.eup %2432  ;;  %v1420_v35 = vsel %vm1388_vm12, %v1372_v48, %v1404_v29  ;;  %v1406_v44 = vmul.f32 0.2, %v1374_v28  ;;  %v1356_v41 = vmul.f32 %v3002_v62, %v1336_v27  ;;  %vm1390_vm14 = vcmp.gt.f32.partialorder %v1374_v28, 0.0  ;;  %v3112_v29 = vld [vmem:[%s3422_s0 + $0x18] sm:$0xff]  }
 0x42f   : > { %v2435_v60 = vpop.eup %2434  ;;  %v1337_v45 = vmul.f32 %v2433_v40, %v2968_v54  ;;  %2301 = vmatmul.mubr.msk.bf16.gmra.mxu0 %vm666_vm2, %v1431_v32  ;;  %v1421_v36 = vsel %vm1389_vm13, %v1373_v47, %v1405_v34  ;;  %v1375_v39 = vadd.f32 %v3008_v4, %v1355_v38  ;;  %v1597_v7 = vunpack.c.h.bf16 %v3090_v17 }
 0x430   : > { %v1338_v14 = vmul.f32 %v2435_v60, %v2971_v37  ;;  %v1432_v43 = vpack.c.bf16 %v1421_v36, %v1420_v35  ;;  %v1376_v15 = vadd.f32 %v3008_v4, %v1356_v41  ;;  %v1422_v6 = vsel %vm1390_vm14, %v1374_v28, %v1406_v44  ;;  %v3125_v44 = vld [vmem:[%s3422_s0 + $0x10] sm:$0xff]  }
 0x431   : > { %vm1391_vm15 = vcmp.gt.f32.partialorder %v1375_v39, 0.0  ;;  %v1407_v51 = vmul.f32 0.2, %v1375_v39  ;;  %v1357_v52 = vmul.f32 %v3002_v62, %v1337_v45  ;;  %v1602_v28 = vunpack.c.l.bf16 %v3112_v29 }
 0x432   : > { %v2437_v55 = vpop.eup %2436  ;;  %2304 = vmatprep.mubr.msk.bf16.mxu0 %vm666_vm2, %v1432_v43  ;;  %v1358_v54 = vmul.f32 %v3002_v62, %v1338_v14  ;;  %v1408_v0 = vmul.f32 0.2, %v1376_v15  ;;  %vm1392_vm0 = vcmp.gt.f32.partialorder %v1376_v15, 0.0  ;;  %v1600_v41 = vunpack.c.l.bf16 %v3125_v44 }
 0x433   : > { %v1339_v59 = vmul.f32 %v2437_v55, %v2980_v56  ;;  %v1423_v8 = vsel %vm1391_vm15, %v1375_v39, %v1407_v51  ;;  %v1377_v63 = vadd.f32 %v3008_v4, %v1357_v52  ;;  %v1603_v51 = vunpack.c.h.bf16 %v3112_v29 }
 0x434   : > { %v1433_v37 = vpack.c.bf16 %v1423_v8, %v1422_v6  ;;  %v1378_v24 = vadd.f32 %v3008_v4, %v1358_v54  ;;  %v1424_v21 = vsel %vm1392_vm0, %v1376_v15, %v1408_v0  ;;  %v1601_v8 = vunpack.c.h.bf16 %v3125_v44 }
 0x435   : > { %vm1393_vm1 = vcmp.gt.f32.partialorder %v1377_v63, 0.0  ;;  %v1409_v20 = vmul.f32 0.2, %v1377_v63  ;;  %v1359_v25 = vmul.f32 %v3002_v62, %v1339_v59  ;;  %v3071_v62 = vld [vmem:[%s3428_s6] ss:$0 sm:$0xff] }
 0x436   : > { %v1410_v42 = vmul.f32 0.2, %v1378_v24  ;;  %vm1394_vm3 = vcmp.gt.f32.partialorder %v1378_v24, 0.0 }
 0x437   : > { %2305 = vmatmul.mubr.msk.bf16.gmra.mxu0 %vm666_vm2, %v1433_v37  ;;  %v1425_v5 = vsel %vm1393_vm1, %v1377_v63, %v1409_v20  ;;  %v1379_v56 = vadd.f32 %v3008_v4, %v1359_v25  ;;  %v2438_v4 = vld [vmem:[%s3422_s0 + $0x8] sm:$0xff]  }
 0x438   : > { %v1434_v10 = vpack.c.bf16 %v1425_v5, %v1424_v21  ;;  %v1426_v12 = vsel %vm1394_vm3, %v1378_v24, %v1410_v42  ;;  %v1598_v49 = vunpack.c.l.bf16 %v2438_v4  ;;  %v1599_v23 = vunpack.c.h.bf16 %v2438_v4  ;;  %v3167_v20 = vld [vmem:[%s3422_s0 + $0x28] sm:$0xff]   ;;  %v3173_v5 = vld [vmem:[%s3422_s0 + $0x20] sm:$0xff]  }
 0x439   : > { %vm1395_vm4 = vcmp.gt.f32.partialorder %v1379_v56, 0.0  ;;  %v1411_v11 = vmul.f32 0.2, %v1379_v56  ;;  %v1606_v25 = vunpack.c.l.bf16 %v3167_v20 }
 0x43a   : > { %2308 = vmatprep.mubr.msk.bf16.mxu0 %vm666_vm2, %v1434_v10 }
 0x43b   : > { %v1427_v13 = vsel %vm1395_vm4, %v1379_v56, %v1411_v11  ;;  %v1604_v56 = vunpack.c.l.bf16 %v3173_v5 }
 0x43c   : > { %v1435_v3 = vpack.c.bf16 %v1427_v13, %v1426_v12  ;;  %v1607_v13 = vunpack.c.h.bf16 %v3167_v20 }
 0x43f   : > { %2309 = vmatmul.mubr.msk.bf16.gmra.mxu0 %vm666_vm2, %v1435_v3  ;;  %vm1644_vm2 = vcmask 23552  }
 0x4e7   : > { %v2298_v30 = vpop.f32.mrf.mxu0 }
 0x4e8   : > { %v1542_v61 = vadd.f32 %v2298_v30, %v3071_v62 }
 0x4e9   : > { %v1533_v50 = vpop.f32.mrf.mxu0 }
 0x4ea   : > { %v1614_v1 = vmul.f32 0.1, %v1542_v61  ;;  %v1534_v53 = vadd.f32 %v3071_v62, %v1533_v50  ;;  %1842 = vrot.lane.b32.xlu0 %v1542_v61, %s2470_s25  ;;  %v1663_v9 = vadd.f32 %v1598_v49, %v1542_v61  ;;  %v1605_v61 = vunpack.c.h.bf16 %v3173_v5 }
 0x4eb   : > { %v2299_v16 = vpop.f32.mrf.mxu0 }
 0x4ec   : > { %v1612_v31 = vmul.f32 0.1, %v1534_v53  ;;  %v1545_v18 = vadd.f32 %v2299_v16, %v3071_v62  ;;  %1697 = vrot.lane.b32.xlu1 %v1663_v9, %s2471_s30  ;;  %v1630_v57 = vadd.f32 %v1614_v1, %v1598_v49  ;;  %v1661_v36 = vadd.f32 %v1596_v58, %v1534_v53 }
 0x4ed   : > { %v1536_v19 = vpop.f32.mrf.mxu0 }
 0x4ee   : > { %v1628_v48 = vadd.f32 %v1612_v31, %v1596_v58  ;;  %v1615_v22 = vmul.f32 0.1, %v1545_v18  ;;  %1647 = vst.msk [vmem:[%s3085_s28 + $0x10] sm:$0xff] %vm1644_vm2, %v1630_v57  ;;  %v3098_v46 = vadd.f32 %v3071_v62, %v1536_v19  ;;  %1761 = vrot.lane.b32.xlu0 %v1663_v9, %s2472_s11  ;;  %v1664_v40 = vadd.f32 %v1599_v23, %v1545_v18  ;;  %v2444_v31 = vld [vmem:[%s3422_s0 + $0x38] sm:$0xff]  }
 0x4ef   : > { %v2302_v26 = vpop.f32.mrf.mxu0 }
 0x4f0   : > { %1645 = vst.msk [vmem:[%s3085_s28] sm:$0xff] %vm1644_vm2, %v1628_v48  ;;  %v1613_v33 = vmul.f32 0.1, %v3098_v46  ;;  %v3106_v47 = vadd.f32 %v2302_v26, %v3071_v62  ;;  %1844 = vrot.lane.b32.xlu1 %v1545_v18, %s2470_s25  ;;  %v1631_v27 = vadd.f32 %v1615_v22, %v1599_v23  ;;  %v1662_v30 = vadd.f32 %v1597_v7, %v3098_v46 }
 0x4f1   : > { %v1549_v2 = vpop.f32.mrf.mxu0  ;;  %v1610_v18 = vunpack.c.l.bf16 %v2444_v31 }
 0x4f2   : > { %v1629_v32 = vadd.f32 %v1613_v33, %v1597_v7  ;;  %v1618_v34 = vmul.f32 0.1, %v3106_v47  ;;  %v3117_v38 = vadd.f32 %v3071_v62, %v1549_v2  ;;  %1838 = vrot.lane.b32.xlu0 %v1534_v53, %s2470_s25  ;;  %1648 = vst.msk [vmem:[%s3085_s28 + $0x18] sm:$0xff] %vm1644_vm2, %v1631_v27  ;;  %v1667_v9 = vadd.f32 %v1602_v28, %v3106_v47 }
 0x4f3   : > { %v2303_v35 = vpop.f32.mrf.mxu0  ;;  %v1611_v27 = vunpack.c.h.bf16 %v2444_v31 }
 0x4f4   : > { %1646 = vst.msk [vmem:[%s3085_s28 + $0x8] sm:$0xff] %vm1644_vm2, %v1629_v32  ;;  %v1616_v60 = vmul.f32 0.1, %v3117_v38  ;;  %v3132_v45 = vadd.f32 %v2303_v35, %v3071_v62  ;;  %1699 = vrot.lane.b32.xlu1 %v1664_v40, %s2471_s30  ;;  %v1634_v39 = vadd.f32 %v1618_v34, %v1602_v28 }
 0x4f5   : > { %v1552_v14 = vpop.f32.mrf.mxu0 }
 0x4f6   : > { %v1619_v43 = vmul.f32 0.1, %v3132_v45  ;;  %v3137_v15 = vadd.f32 %v3071_v62, %v1552_v14  ;;  %1693 = vrot.lane.b32.xlu0 %v1661_v36, %s2471_s30  ;;  %1651 = vst.msk [vmem:[%s3085_s28 + $0x30] sm:$0xff] %vm1644_vm2, %v1634_v39  ;;  %v1632_v52 = vadd.f32 %v1616_v60, %v1600_v41  ;;  %v1665_v60 = vadd.f32 %v1600_v41, %v3117_v38 }
 0x4f7   : > { %v2306_v55 = vpop.f32.mrf.mxu0 }
 0x4f8   : > { %v1617_v6 = vmul.f32 0.1, %v3137_v15  ;;  %v3147_v54 = vadd.f32 %v2306_v55, %v3071_v62  ;;  %1763 = vrot.lane.b32.xlu1 %v1664_v40, %s2472_s11  ;;  %v1635_v59 = vadd.f32 %v1619_v43, %v1603_v51  ;;  %1649 = vst.msk [vmem:[%s3085_s28 + $0x20] sm:$0xff] %vm1644_vm2, %v1632_v52  ;;  %v1666_v29 = vadd.f32 %v1601_v8, %v3137_v15 }
 0x4f9   : > { %v1565_v63 = vpop.f32.mrf.mxu0 }
 0x4fa   : > { %v1622_v0 = vmul.f32 0.1, %v3147_v54  ;;  %v3157_v37 = vadd.f32 %v3071_v62, %v1565_v63  ;;  %1757 = vrot.lane.b32.xlu0 %v1661_v36, %s2472_s11  ;;  %1652 = vst.msk [vmem:[%s3085_s28 + $0x38] sm:$0xff] %vm1644_vm2, %v1635_v59  ;;  %v1633_v24 = vadd.f32 %v1617_v6, %v1601_v8 }
 0x4fb   : > { %v2307_v21 = vpop.f32.mrf.mxu0 }
 0x4fc   : > { %v1620_v42 = vmul.f32 0.1, %v3157_v37  ;;  %v3178_v10 = vadd.f32 %v2307_v21, %v3071_v62  ;;  %1840 = vrot.lane.b32.xlu1 %v3098_v46, %s2470_s25  ;;  %1650 = vst.msk [vmem:[%s3085_s28 + $0x28] sm:$0xff] %vm1644_vm2, %v1633_v24  ;;  %v1638_v11 = vadd.f32 %v1622_v0, %v1606_v25  ;;  %v2445_v46 = vld [vmem:[%s3422_s0 + $0x30] sm:$0xff]   ;;  %v1669_v41 = vadd.f32 %v1604_v56, %v3157_v37 }
 0x4fd   : > { %v1568_v12 = vpop.f32.mrf.mxu0  ;;  %v1608_v23 = vunpack.c.l.bf16 %v2445_v46  ;;  %v1609_v34 = vunpack.c.h.bf16 %v2445_v46 }
 0x4fe   : > { %v1636_v3 = vadd.f32 %v1620_v42, %v1604_v56  ;;  %v1623_v4 = vmul.f32 0.1, %v3178_v10  ;;  %v3191_v49 = vadd.f32 %v3071_v62, %v1568_v12  ;;  %1850 = vrot.lane.b32.xlu0 %v3106_v47, %s2470_s25  ;;  %1655 = vst.msk [vmem:[%s3085_s28 + $0x50] sm:$0xff] %vm1644_vm2, %v1638_v11  ;;  %v1672_v44 = vadd.f32 %v1607_v13, %v3178_v10 }
 0x4ff   : > { %v2310_v50 = vpop.f32.mrf.mxu0 }
 0x500   : > { %1653 = vst.msk [vmem:[%s3085_s28 + $0x40] sm:$0xff] %vm1644_vm2, %v1636_v3  ;;  %v1621_v1 = vmul.f32 0.1, %v3191_v49  ;;  %v3203_v53 = vadd.f32 %v2310_v50, %v3071_v62  ;;  %1695 = vrot.lane.b32.xlu1 %v1662_v30, %s2471_s30  ;;  %v1639_v16 = vadd.f32 %v1623_v4, %v1607_v13  ;;  %v1670_v36 = vadd.f32 %v1605_v61, %v3191_v49 }
 0x501   : > { %v1581_v17 = vpop.f32.mrf.mxu0 }
 0x502   : > { %v1637_v58 = vadd.f32 %v1621_v1, %v1605_v61  ;;  %v1626_v57 = vmul.f32 0.1, %v3203_v53  ;;  %v1582_v19 = vadd.f32 %v3071_v62, %v1581_v17  ;;  %1705 = vrot.lane.b32.xlu0 %v1667_v9, %s2471_s30  ;;  %1656 = vst.msk [vmem:[%s3085_s28 + $0x58] sm:$0xff] %vm1644_vm2, %v1639_v16 }
 0x503   : > { %v2311_v48 = vpop.f32.mrf.mxu0 }
 0x504   : > { %1654 = vst.msk [vmem:[%s3085_s28 + $0x48] sm:$0xff] %vm1644_vm2, %v1637_v58  ;;  %v1642_v22 = vadd.f32 %v1626_v57, %v1610_v18  ;;  %v1624_v26 = vmul.f32 0.1, %v1582_v19  ;;  %v1593_v7 = vadd.f32 %v2311_v48, %v3071_v62  ;;  %1759 = vrot.lane.b32.xlu1 %v1662_v30, %s2472_s11  ;;  %v1673_v14 = vadd.f32 %v1608_v23, %v1582_v19 }
 0x505   : > { %v1584_v33 = vpop.f32.mrf.mxu0 }
 0x506   : > { %1659 = vst.msk [vmem:[%s3085_s28 + $0x70] sm:$0xff] %vm1644_vm2, %v1642_v22  ;;  %v1640_v47 = vadd.f32 %v1624_v26, %v1608_v23  ;;  %v1627_v2 = vmul.f32 0.1, %v1593_v7  ;;  %v1585_v28 = vadd.f32 %v3071_v62, %v1584_v33  ;;  %1769 = vrot.lane.b32.xlu0 %v1667_v9, %s2472_s11  ;;  %v1668_v62 = vadd.f32 %v1603_v51, %v3132_v45 }
 0x507   : > { %v1676_v39 = vadd.f32 %v1611_v27, %v1593_v7 }
 0x508   : > { %1657 = vst.msk [vmem:[%s3085_s28 + $0x60] sm:$0xff] %vm1644_vm2, %v1640_v47  ;;  %v1643_v32 = vadd.f32 %v1627_v2, %v1611_v27  ;;  %v1625_v40 = vmul.f32 0.1, %v1585_v28  ;;  %1852 = vrot.lane.b32.xlu1 %v3132_v45, %s2470_s25  ;;  %v1675_v45 = vadd.f32 %v1610_v18, %v3203_v53  ;;  %v1674_v43 = vadd.f32 %v1609_v34, %v1585_v28 }
 0x50a   : > { %1660 = vst.msk [vmem:[%s3085_s28 + $0x78] sm:$0xff] %vm1644_vm2, %v1643_v32  ;;  %v1641_v35 = vadd.f32 %v1625_v40, %v1609_v34  ;;  %1846 = vrot.lane.b32.xlu0 %v3117_v38, %s2470_s25  ;;  %v1671_v38 = vadd.f32 %v1606_v25, %v3147_v54 }
 0x50c   : > { %1658 = vst.msk [vmem:[%s3085_s28 + $0x68] sm:$0xff] %vm1644_vm2, %v1641_v35  ;;  %1707 = vrot.lane.b32.xlu1 %v1668_v62, %s2471_s30 }
 0x50e   : > { %1701 = vrot.lane.b32.xlu0 %v1665_v60, %s2471_s30 }
 0x510   : > { %1771 = vrot.lane.b32.xlu1 %v1668_v62, %s2472_s11 }
 0x512   : > { %1765 = vrot.lane.b32.xlu0 %v1665_v60, %s2472_s11 }
 0x514   : > { %1848 = vrot.lane.b32.xlu1 %v3137_v15, %s2470_s25 }
 0x516   : > { %1858 = vrot.lane.b32.xlu0 %v3147_v54, %s2470_s25 }
 0x518   : > { %1703 = vrot.lane.b32.xlu1 %v1666_v29, %s2471_s30 }
 0x51a   : > { %1713 = vrot.lane.b32.xlu0 %v1671_v38, %s2471_s30 }
 0x51c   : > { %1767 = vrot.lane.b32.xlu1 %v1666_v29, %s2472_s11 }
 0x51e   : > { %1777 = vrot.lane.b32.xlu0 %v1671_v38, %s2472_s11 }
 0x520   : > { %1860 = vrot.lane.b32.xlu1 %v3178_v10, %s2470_s25 }
 0x522   : > { %1854 = vrot.lane.b32.xlu0 %v3157_v37, %s2470_s25 }
 0x524   : > { %1715 = vrot.lane.b32.xlu1 %v1672_v44, %s2471_s30 }
 0x526   : > { %1709 = vrot.lane.b32.xlu0 %v1669_v41, %s2471_s30 }
 0x528   : > { %1779 = vrot.lane.b32.xlu1 %v1672_v44, %s2472_s11 }
 0x52a   : > { %1773 = vrot.lane.b32.xlu0 %v1669_v41, %s2472_s11 }
 0x52c   : > { %1856 = vrot.lane.b32.xlu1 %v3191_v49, %s2470_s25 }
 0x52e   : > { %1721 = vrot.lane.b32.xlu0 %v1675_v45, %s2471_s30 }
 0x530   : > { %1711 = vrot.lane.b32.xlu1 %v1670_v36, %s2471_s30 }
 0x532   : > { %1785 = vrot.lane.b32.xlu0 %v1675_v45, %s2472_s11 }
 0x534   : > { %1775 = vrot.lane.b32.xlu1 %v1670_v36, %s2472_s11 }
 0x536   : > { %1862 = vrot.lane.b32.xlu0 %v1582_v19, %s2470_s25 }
 0x538   : > { %1723 = vrot.lane.b32.xlu1 %v1676_v39, %s2471_s30 }
 0x53a   : > { %1717 = vrot.lane.b32.xlu0 %v1673_v14, %s2471_s30 }
 0x53c   : > { %1787 = vrot.lane.b32.xlu1 %v1676_v39, %s2472_s11 }
 0x53e   : > { %1781 = vrot.lane.b32.xlu0 %v1673_v14, %s2472_s11 }
 0x540   : > { %1864 = vrot.lane.b32.xlu1 %v1585_v28, %s2470_s25 }
 0x542   : > { %1866 = vrot.lane.b32.xlu0 %v3203_v53, %s2470_s25 }
 0x544   : > { %1719 = vrot.lane.b32.xlu1 %v1674_v43, %s2471_s30 }
 0x548   : > { %1783 = vrot.lane.b32.xlu1 %v1674_v43, %s2472_s11  ;;  %s3317_s11 = scalar_lea.vmem %s3431_s9, %s3077_s24 }
 0x54c   : > { %1868 = vrot.lane.b32.xlu1 %v1593_v7, %s2470_s25 }
 0x55c   : > { %v1843_v15 = vpop.permute.xlu0 %1842 }
 0x55d   : > { %1889 = vst.msk [vmem:[%s3303_s17 + $0x10] sm:$0xff] %vm1886_vm5, %v1843_v15 }
 0x55e   : > { %v1698_v51 = vpop.permute.xlu1 %1697 }
 0x55f   : > { %1743 = vst.msk [vmem:[%s3309_s20 + $0x10] sm:$0xff] %vm1644_vm2, %v1698_v51 }
 0x560   : > { %v1762_v52 = vpop.permute.xlu0 %1761 }
 0x561   : > { %1808 = vst.msk [vmem:[%s3317_s11 + $0x10] sm:$0xff] %vm1805_vm6, %v1762_v52 }
 0x562   : > { %v1845_v55 = vpop.permute.xlu1 %1844 }
 0x563   : > { %1890 = vst.msk [vmem:[%s3303_s17 + $0x18] sm:$0xff] %vm1886_vm5, %v1845_v55 }
 0x564   : > { %v1839_v6 = vpop.permute.xlu0 %1838 }
 0x565   : > { %1887 = vst.msk [vmem:[%s3303_s17] sm:$0xff] %vm1886_vm5, %v1839_v6 }
 0x566   : > { %v1700_v54 = vpop.permute.xlu1 %1699 }
 0x567   : > { %1744 = vst.msk [vmem:[%s3309_s20 + $0x18] sm:$0xff] %vm1644_vm2, %v1700_v54 }
 0x568   : > { %v1694_v59 = vpop.permute.xlu0 %1693 }
 0x569   : > { %1741 = vst.msk [vmem:[%s3309_s20] sm:$0xff] %vm1644_vm2, %v1694_v59 }
 0x56a   : > { %v1764_v8 = vpop.permute.xlu1 %1763 }
 0x56b   : > { %1809 = vst.msk [vmem:[%s3317_s11 + $0x18] sm:$0xff] %vm1805_vm6, %v1764_v8 }
 0x56c   : > { %v1758_v63 = vpop.permute.xlu0 %1757 }
 0x56d   : > { %1806 = vst.msk [vmem:[%s3317_s11] sm:$0xff] %vm1805_vm6, %v1758_v63 }
 0x56e   : > { %v1841_v0 = vpop.permute.xlu1 %1840 }
 0x56f   : > { %1888 = vst.msk [vmem:[%s3303_s17 + $0x8] sm:$0xff] %vm1886_vm5, %v1841_v0 }
 0x570   : > { %v1851_v37 = vpop.permute.xlu0 %1850 }
 0x571   : > { %1893 = vst.msk [vmem:[%s3303_s17 + $0x30] sm:$0xff] %vm1886_vm5, %v1851_v37 }
 0x572   : > { %v1696_v24 = vpop.permute.xlu1 %1695 }
 0x573   : > { %1742 = vst.msk [vmem:[%s3309_s20 + $0x8] sm:$0xff] %vm1644_vm2, %v1696_v24 }
 0x574   : > { %v1706_v20 = vpop.permute.xlu0 %1705 }
 0x575   : > { %1747 = vst.msk [vmem:[%s3309_s20 + $0x30] sm:$0xff] %vm1644_vm2, %v1706_v20 }
 0x576   : > { %v1760_v25 = vpop.permute.xlu1 %1759 }
 0x577   : > { %1807 = vst.msk [vmem:[%s3317_s11 + $0x8] sm:$0xff] %vm1805_vm6, %v1760_v25 }
 0x578   : > { %v1770_v21 = vpop.permute.xlu0 %1769 }
 0x579   : > { %1812 = vst.msk [vmem:[%s3317_s11 + $0x30] sm:$0xff] %vm1805_vm6, %v1770_v21 }
 0x57a   : > { %v1853_v5 = vpop.permute.xlu1 %1852 }
 0x57b   : > { %1894 = vst.msk [vmem:[%s3303_s17 + $0x38] sm:$0xff] %vm1886_vm5, %v1853_v5 }
 0x57c   : > { %v1847_v56 = vpop.permute.xlu0 %1846 }
 0x57d   : > { %1891 = vst.msk [vmem:[%s3303_s17 + $0x20] sm:$0xff] %vm1886_vm5, %v1847_v56 }
 0x57e   : > { %v1708_v42 = vpop.permute.xlu1 %1707 }
 0x57f   : > { %1748 = vst.msk [vmem:[%s3309_s20 + $0x38] sm:$0xff] %vm1644_vm2, %v1708_v42 }
 0x580   : > { %v1702_v10 = vpop.permute.xlu0 %1701 }
 0x581   : > { %1745 = vst.msk [vmem:[%s3309_s20 + $0x20] sm:$0xff] %vm1644_vm2, %v1702_v10 }
 0x582   : > { %v1772_v11 = vpop.permute.xlu1 %1771 }
 0x583   : > { %1813 = vst.msk [vmem:[%s3317_s11 + $0x38] sm:$0xff] %vm1805_vm6, %v1772_v11 }
 0x584   : > { %v1766_v12 = vpop.permute.xlu0 %1765 }
 0x585   : > { %1810 = vst.msk [vmem:[%s3317_s11 + $0x20] sm:$0xff] %vm1805_vm6, %v1766_v12 }
 0x586   : > { %v1849_v13 = vpop.permute.xlu1 %1848 }
 0x587   : > { %1892 = vst.msk [vmem:[%s3303_s17 + $0x28] sm:$0xff] %vm1886_vm5, %v1849_v13 }
 0x588   : > { %v1859_v3 = vpop.permute.xlu0 %1858 }
 0x589   : > { %1897 = vst.msk [vmem:[%s3303_s17 + $0x50] sm:$0xff] %vm1886_vm5, %v1859_v3 }
 0x58a   : > { %v1704_v4 = vpop.permute.xlu1 %1703 }
 0x58b   : > { %1746 = vst.msk [vmem:[%s3309_s20 + $0x28] sm:$0xff] %vm1644_vm2, %v1704_v4 }
 0x58c   : > { %v1714_v49 = vpop.permute.xlu0 %1713 }
 0x58d   : > { %1751 = vst.msk [vmem:[%s3309_s20 + $0x50] sm:$0xff] %vm1644_vm2, %v1714_v49 }
 0x58e   : > { %v1768_v30 = vpop.permute.xlu1 %1767 }
 0x58f   : > { %1811 = vst.msk [vmem:[%s3317_s11 + $0x28] sm:$0xff] %vm1805_vm6, %v1768_v30 }
 0x590   : > { %v1778_v61 = vpop.permute.xlu0 %1777 }
 0x591   : > { %1816 = vst.msk [vmem:[%s3317_s11 + $0x50] sm:$0xff] %vm1805_vm6, %v1778_v61 }
 0x592   : > { %v1861_v50 = vpop.permute.xlu1 %1860 }
 0x593   : > { %1898 = vst.msk [vmem:[%s3303_s17 + $0x58] sm:$0xff] %vm1886_vm5, %v1861_v50 }
 0x594   : > { %v1855_v1 = vpop.permute.xlu0 %1854 }
 0x595   : > { %1895 = vst.msk [vmem:[%s3303_s17 + $0x40] sm:$0xff] %vm1886_vm5, %v1855_v1 }
 0x596   : > { %v1716_v53 = vpop.permute.xlu1 %1715 }
 0x597   : > { %1752 = vst.msk [vmem:[%s3309_s20 + $0x58] sm:$0xff] %vm1644_vm2, %v1716_v53 }
 0x598   : > { %v1710_v9 = vpop.permute.xlu0 %1709 }
 0x599   : > { %1749 = vst.msk [vmem:[%s3309_s20 + $0x40] sm:$0xff] %vm1644_vm2, %v1710_v9 }
 0x59a   : > { %v1780_v16 = vpop.permute.xlu1 %1779 }
 0x59b   : > { %1817 = vst.msk [vmem:[%s3317_s11 + $0x58] sm:$0xff] %vm1805_vm6, %v1780_v16 }
 0x59c   : > { %v1774_v17 = vpop.permute.xlu0 %1773 }
 0x59d   : > { %1814 = vst.msk [vmem:[%s3317_s11 + $0x40] sm:$0xff] %vm1805_vm6, %v1774_v17 }
 0x59e   : > { %v1857_v58 = vpop.permute.xlu1 %1856 }
 0x59f   : > { %1896 = vst.msk [vmem:[%s3303_s17 + $0x48] sm:$0xff] %vm1886_vm5, %v1857_v58 }
 0x5a0   : > { %v1722_v31 = vpop.permute.xlu0 %1721 }
 0x5a1   : > { %1755 = vst.msk [vmem:[%s3309_s20 + $0x70] sm:$0xff] %vm1644_vm2, %v1722_v31 }
 0x5a2   : > { %v1712_v18 = vpop.permute.xlu1 %1711 }
 0x5a3   : > { %1750 = vst.msk [vmem:[%s3309_s20 + $0x48] sm:$0xff] %vm1644_vm2, %v1712_v18 }
 0x5a4   : > { %v1786_v57 = vpop.permute.xlu0 %1785 }
 0x5a5   : > { %1820 = vst.msk [vmem:[%s3317_s11 + $0x70] sm:$0xff] %vm1805_vm6, %v1786_v57 }
 0x5a6   : > { %v1776_v19 = vpop.permute.xlu1 %1775 }
 0x5a7   : > { %1815 = vst.msk [vmem:[%s3317_s11 + $0x48] sm:$0xff] %vm1805_vm6, %v1776_v19 }
 0x5a8   : > { %v1863_v48 = vpop.permute.xlu0 %1862 }
 0x5a9   : > { %1899 = vst.msk [vmem:[%s3303_s17 + $0x60] sm:$0xff] %vm1886_vm5, %v1863_v48 }
 0x5aa   : > { %v1724_v22 = vpop.permute.xlu1 %1723 }
 0x5ab   : > { %1756 = vst.msk [vmem:[%s3309_s20 + $0x78] sm:$0xff] %vm1644_vm2, %v1724_v22 }
 0x5ac   : > { %v1718_v46 = vpop.permute.xlu0 %1717 }
 0x5ad   : > { %1753 = vst.msk [vmem:[%s3309_s20 + $0x60] sm:$0xff] %vm1644_vm2, %v1718_v46 }
 0x5ae   : > { %v1788_v23 = vpop.permute.xlu1 %1787 }
 0x5af   : > { %1821 = vst.msk [vmem:[%s3317_s11 + $0x78] sm:$0xff] %vm1805_vm6, %v1788_v23 }
 0x5b0   : > { %v1782_v26 = vpop.permute.xlu0 %1781 }
 0x5b1   : > { %1818 = vst.msk [vmem:[%s3317_s11 + $0x60] sm:$0xff] %vm1805_vm6, %v1782_v26 }
 0x5b2   : > { %v1865_v7 = vpop.permute.xlu1 %1864 }
 0x5b3   : > { %1900 = vst.msk [vmem:[%s3303_s17 + $0x68] sm:$0xff] %vm1886_vm5, %v1865_v7 }
 0x5b4   : > { %v1867_v33 = vpop.permute.xlu0 %1866 }
 0x5b5   : > { %1901 = vst.msk [vmem:[%s3303_s17 + $0x70] sm:$0xff] %vm1886_vm5, %v1867_v33 }
 0x5b6   : > { %v1720_v47 = vpop.permute.xlu1 %1719 }
 0x5b7   : > { %1754 = vst.msk [vmem:[%s3309_s20 + $0x68] sm:$0xff] %vm1644_vm2, %v1720_v47 }
 0x5ba   : > { %v1784_v27 = vpop.permute.xlu1 %1783 }
 0x5bb   : > { %1819 = vst.msk [vmem:[%s3317_s11 + $0x68] sm:$0xff] %vm1805_vm6, %v1784_v27 }
 0x5be   : > { %v1869_v2 = vpop.permute.xlu1 %1868 }
 0x5bf   : > { %1902 = vst.msk [vmem:[%s3303_s17 + $0x78] sm:$0xff] %vm1886_vm5, %v1869_v2 }
 0x5c0 PF: > { %s21_s15 = sadd.s32 1, %s2468_s15   ;;  %s3433_s13 = smov %s2464_s14 }
 0x5c1   : > { %p18_p5 = scmp.ge.s32.totalorder %s21_s15, 4   ;;  %s3434_s14 = smov %s3436_s16 }
 0x5c3   :  { %20 = sbr.rel (!%p18_p5) target bundleno = 2 (0x2), region = 115 }

</bundles_post_ra>
